<compile_context>
chip_gen: v5e
topology: v5e:2x2
jax: 0.10.0
libtpu: 0.0.40
codegen_flags: <defaults>
</compile_context>

<pallas_src>
import functools
import math

import jax
import jax.numpy as jnp
from jax.experimental import pallas as pl
from jax.experimental.pallas import tpu as pltpu


# ----------------------------------------------------------------------------
# Sinusoidal relative positional embedding (parameter construction, glue)
# ----------------------------------------------------------------------------
def relative_sinusoidal_pos_embed(seq_len, embedding_dim, padding_idx=0,
                                  init_size=1024):
    """Reproduces RelativeSinusoidalPositionalEmbedding.forward for a (B, L) mask."""
    num_embeddings = init_size + 1
    half_dim = embedding_dim // 2
    scale = math.log(10000) / (half_dim - 1)
    inv_freq = jnp.exp(jnp.arange(half_dim, dtype=jnp.float32) * -scale)
    pos = jnp.arange(-num_embeddings // 2, num_embeddings // 2,
                     dtype=jnp.float32)                        # (num_embeddings,)
    emb = pos[:, None] * inv_freq[None, :]                     # (N, half)
    emb = jnp.concatenate([jnp.sin(emb), jnp.cos(emb)], axis=1)
    if embedding_dim % 2 == 1:
        emb = jnp.concatenate(
            [emb, jnp.zeros((num_embeddings, 1), jnp.float32)], axis=1)
    emb = emb.at[padding_idx].set(0.0)
    origin_shift = num_embeddings // 2 + 1
    assert padding_idx + seq_len < origin_shift, "init_size too small for seq_len"
    positions = jnp.arange(-seq_len, seq_len) + origin_shift
    return emb[positions]                                      # (2L, embedding_dim)


# ----------------------------------------------------------------------------
# Pallas kernel: one (batch, query-tile) per grid step, all heads inside
# ----------------------------------------------------------------------------
def _rel_attn_kernel(q_ref, kT_ref, v_ref, posT_ref, rr_ref, dterm_ref, bias_ref,
                     o_ref, *, num_heads, head_dim, seq_len, q_tile, num_q_tiles):
    H, hd, L = num_heads, head_dim, seq_len

    q = q_ref[0]                               # (tq, D)   bf16  (x @ Wq from glue)
    v = v_ref[0]                               # (L, D)    bf16  (x @ Wv from glue)
    posT = posT_ref[...]                       # (hd, 2L)  bf16
    bias = bias_ref[0]                         # (1, L)    f32 additive key mask
    q_rr = q + rr_ref[...]                     # (tq, D)   bf16, q + r_r_bias (one VPU add)

    # Relative shift: BD_shift[i, j] = BD[i, L + j - (q0 + i)], i.e. per-sublane roll
    # by (L + q0 + i) along lanes.  q0 is the global row offset of this query tile.
    if num_q_tiles == 1:
        shift = L                                    # static shift (single-tile path)
    else:
        shift = L + pl.program_id(1) * q_tile        # dynamic base shift per tile

    outs = []
    for h in range(H):                               # static unroll over heads
        sl = slice(h * hd, (h + 1) * hd)
        q_h = q[:, sl]                               # (tq, hd)
        qrr_h = q_rr[:, sl]                          # (tq, hd)
        kT_h = kT_ref[0, h]                          # (hd, L)   bf16
        v_h = v[:, sl]                               # (L, hd)   bf16

        # AC = (q + r_r_bias) . k^T  -> (tq, L)   (bf16 MXU, f32 accumulate)
        ac = jnp.dot(qrr_h, kT_h, preferred_element_type=jnp.float32)
        # B  = q . pos^T             -> (tq, 2L)
        b_ = jnp.dot(q_h, posT, preferred_element_type=jnp.float32)
        # D  term precomputed in glue (r_w_bias . pos^T), broadcast over queries
        bd = b_ + dterm_ref[h:h + 1, :]              # (tq, 2L)
        # Transformer-XL relative shift as ONE strided cross-lane rotate (XLU)
        bd = pltpu.roll(bd, shift, 1, stride=1, stride_axis=0)[:, :L]

        logits = ac + bd + bias                      # (tq, L)
        m = jnp.max(logits, axis=-1, keepdims=True)
        e = jnp.exp(logits - m)
        p = e * pl.reciprocal(jnp.sum(e, axis=-1, keepdims=True), approx=True)
        # TODO(synk): dropout on attention probs omitted (eval mode / p=0).
        outs.append(jnp.dot(p.astype(jnp.bfloat16), v_h,
                            preferred_element_type=jnp.float32))   # (tq, hd)

    # Heads concatenated along the feature axis == matmul(attn, v).transpose(1,2).reshape
    o_ref[0] = jnp.concatenate(outs, axis=-1).astype(o_ref.dtype)  # lane-dense (tq, D)


def relative_multi_head_attn(x, mask, wq, wv, r_r_bias, r_w_bias, pos_embed,
                             num_heads, *, q_tile=None):
    """Forward of RelativeMultiHeadAttn (k_as_x=True).  x: (B, L, D), mask: (B, L)."""
    B, L, D = x.shape
    H = num_heads
    hd = D // H

    if q_tile is None:
        q_tile = min(L, 128)
    assert L % q_tile == 0
    num_q_tiles = L // q_tile

    # ---- glue (XLA): lane-dense full-width projections + layout prep ----
    q_full = jnp.einsum('bld,de->ble', x, wq).astype(jnp.bfloat16)          # (B, L, D)
    v_full = jnp.einsum('bld,de->ble', x, wv).astype(jnp.bfloat16)          # (B, L, D)
    kT = x.reshape(B, L, H, hd).transpose(0, 2, 3, 1).astype(jnp.bfloat16)  # (B, H, hd, L)
    posT = pos_embed.T.astype(jnp.bfloat16)                                 # (hd, 2L)
    rr = r_r_bias.reshape(1, D).astype(jnp.bfloat16)                        # (1, D)
    dterm = jnp.einsum('nd,ld->nl', r_w_bias, pos_embed).astype(jnp.float32)  # (H, 2L)
    bias = jnp.where(mask[:, None, :] == 0, -1e30, 0.0).astype(jnp.float32)   # (B, 1, L)

    kernel = functools.partial(
        _rel_attn_kernel, num_heads=H, head_dim=hd, seq_len=L,
        q_tile=q_tile, num_q_tiles=num_q_tiles)

    return pl.pallas_call(
        kernel,
        out_shape=jax.ShapeDtypeStruct((B, L, D), jnp.float32),
        grid_spec=pltpu.PrefetchScalarGridSpec(
            num_scalar_prefetch=0,
            grid=(B, num_q_tiles),
            in_specs=[
                pl.BlockSpec((1, q_tile, D), lambda b, qi: (b, qi, 0)),    # q
                pl.BlockSpec((1, H, hd, L), lambda b, qi: (b, 0, 0, 0)),   # k^T per head
                pl.BlockSpec((1, L, D), lambda b, qi: (b, 0, 0)),          # v
                pl.BlockSpec((hd, 2 * L), lambda b, qi: (0, 0)),           # pos^T
                pl.BlockSpec((1, D), lambda b, qi: (0, 0)),                # r_r_bias
                pl.BlockSpec((H, 2 * L), lambda b, qi: (0, 0)),            # D_ term
                pl.BlockSpec((1, 1, L), lambda b, qi: (b, 0, 0)),          # mask bias
            ],
            out_specs=pl.BlockSpec((1, q_tile, D), lambda b, qi: (b, qi, 0)),
        ),
        compiler_params=pltpu.CompilerParams(
            dimension_semantics=("parallel", "parallel"),
            vmem_limit_bytes=64 * 1024 * 1024),
    )(q_full, kT, v_full, posT, rr, dterm, bias)


# ----------------------------------------------------------------------------
# Pure-JAX reference mirroring the PyTorch forward (for correctness check).
# `mxu_dtype=bf16` applies the same operand casts as the kernel -> tight compare.
# ----------------------------------------------------------------------------
def reference_forward(x, mask, wq, wv, r_r_bias, r_w_bias, pos_embed, num_heads,
                      mxu_dtype=jnp.float32):
    B, L, D = x.shape
    H = num_heads
    hd = D // H
    f32 = jnp.float32

    q = jnp.einsum('bld,de->ble', x, wq)
    v = jnp.einsum('bld,de->ble', x, wv)

    qc = q.astype(mxu_dtype)
    vc = v.astype(mxu_dtype)
    kc = x.astype(mxu_dtype)
    pc = pos_embed.astype(mxu_dtype)
    qrr = qc + r_r_bias.reshape(1, 1, D).astype(mxu_dtype)

    qh = qc.reshape(B, L, H, hd).transpose(0, 2, 1, 3)
    qrrh = qrr.reshape(B, L, H, hd).transpose(0, 2, 1, 3)
    kh = kc.reshape(B, L, H, hd).transpose(0, 2, 1, 3)
    vh = vc.reshape(B, L, H, hd).transpose(0, 2, 1, 3)

    AC = jnp.einsum('bnqd,bnkd->bnqk', qrrh, kh, preferred_element_type=f32)
    D_ = jnp.einsum('nd,ld->nl', r_w_bias, pos_embed)[None, :, None]
    B_ = jnp.einsum('bnqd,ld->bnql', qh, pc, preferred_element_type=f32)
    BD = B_ + D_
    # torch _shift
    zero_pad = jnp.zeros((B, H, L, 1), BD.dtype)
    BDp = jnp.concatenate([BD, zero_pad], axis=-1).reshape(B, H, -1, L)
    BDp = BDp[:, :, :2 * L, :].reshape(B, H, L, -1)
    BD_shift = BDp[..., L:]
    attn = AC + BD_shift
    attn = jnp.where(mask[:, None, None, :] == 0, -1e30, attn)
    attn = jax.nn.softmax(attn, axis=-1)
    out = jnp.einsum('bnqk,bnkd->bnqd', attn.astype(mxu_dtype), vh,
                     preferred_element_type=f32)
    return out.transpose(0, 2, 1, 3).reshape(B, L, D)


# ----------------------------------------------------------------------------
if __name__ == "__main__":
    B, L, D, H = 2, 64, 128, 4
    hd = D // H

    key = jax.random.PRNGKey(0)
    k_wq, k_wv, k_rr, k_rw, k_x = jax.random.split(key, 5)

    # deterministic synthetic parameters (shapes from __init__)
    wq = jax.random.normal(k_wq, (D, D), jnp.float32) / math.sqrt(D)   # qv_linear (q half)
    wv = jax.random.normal(k_wv, (D, D), jnp.float32) / math.sqrt(D)   # qv_linear (v half)
    xavier_std = math.sqrt(2.0 / (H + hd))
    r_r_bias = jax.random.normal(k_rr, (H, hd), jnp.float32) * xavier_std
    r_w_bias = jax.random.normal(k_rw, (H, hd), jnp.float32) * xavier_std

    x = jax.random.normal(k_x, (B, L, D), jnp.float32)
    mask = jnp.ones((B, L), jnp.int32).at[1, -5:].set(0)   # last 5 keys of batch 1 masked

    pos_embed = relative_sinusoidal_pos_embed(L, hd, padding_idx=0, init_size=1024)

    out = relative_multi_head_attn(x, mask, wq, wv, r_r_bias, r_w_bias,
                                   pos_embed, H)
    out = jax.block_until_ready(out)
    assert out.shape == (B, L, D)

    # Tight check vs reference with matching bf16 operand rounding (structure check).
    ref_bf16 = reference_forward(x, mask, wq, wv, r_r_bias, r_w_bias, pos_embed, H,
                                 mxu_dtype=jnp.bfloat16)
    # Loose check vs pure-f32 PyTorch-semantics reference (bf16 MXU noise allowance).
    ref_f32 = reference_forward(x, mask, wq, wv, r_r_bias, r_w_bias, pos_embed, H,
                                mxu_dtype=jnp.float32)

    err_tight = float(jnp.max(jnp.abs(out - ref_bf16)))
    err_loose = float(jnp.max(jnp.abs(out - ref_f32)))
    assert jnp.allclose(out, ref_bf16, atol=1e-2, rtol=1e-2), \
        f"bf16-matched reference mismatch, max abs err {err_tight}"
    assert jnp.allclose(out, ref_f32, atol=2e-1, rtol=2e-1), \
        f"f32 reference mismatch, max abs err {err_loose}"

    print("KERNEL_OK")
</pallas_src>

<mosaic_0001>
module attributes {stable_mosaic.version = 11 : i64} {
  func.func @_rel_attn_kernel(%arg0: i32, %arg1: i32, %arg2: memref<1x64x128xbf16, #tpu.memory_space<vmem>>, %arg3: memref<1x4x32x64xbf16, #tpu.memory_space<vmem>>, %arg4: memref<1x64x128xbf16, #tpu.memory_space<vmem>>, %arg5: memref<32x128xbf16, #tpu.memory_space<vmem>>, %arg6: memref<1x128xbf16, #tpu.memory_space<vmem>>, %arg7: memref<4x128xf32, #tpu.memory_space<vmem>>, %arg8: memref<1x1x64xf32, #tpu.memory_space<vmem>>, %arg9: memref<1x64x128xf32, #tpu.memory_space<vmem>>) attributes {dimension_semantics = [#tpu.dimension_semantics<parallel>, #tpu.dimension_semantics<parallel>], iteration_bounds = array<i64: 2, 1>, scalar_prefetch = 0 : i64, scratch_operands = 0 : i64, tpu.core_type = #tpu.core_type<tc>, window_params = [{transform_indices = @transform_0, window_bounds = array<i64: 1, 64, 128>}, {transform_indices = @transform_1, window_bounds = array<i64: 1, 4, 32, 64>}, {transform_indices = @transform_2, window_bounds = array<i64: 1, 64, 128>}, {pipeline_mode = #tpu.pipeline_mode<synchronous>, transform_indices = @transform_3, window_bounds = array<i64: 32, 128>}, {pipeline_mode = #tpu.pipeline_mode<synchronous>, transform_indices = @transform_4, window_bounds = array<i64: 1, 128>}, {pipeline_mode = #tpu.pipeline_mode<synchronous>, transform_indices = @transform_5, window_bounds = array<i64: 4, 128>}, {transform_indices = @transform_6, window_bounds = array<i64: 1, 1, 64>}, {transform_indices = @transform_7, window_bounds = array<i64: 1, 64, 128>}]} {
    %c0 = arith.constant 0 : index
    %c0_0 = arith.constant 0 : index
    %c0_1 = arith.constant 0 : index
    %0 = vector.load %arg2[%c0, %c0_0, %c0_1] : memref<1x64x128xbf16, #tpu.memory_space<vmem>>, vector<1x64x128xbf16>
    %1 = vector.shape_cast %0 : vector<1x64x128xbf16> to vector<64x128xbf16>
    %c0_2 = arith.constant 0 : index
    %c0_3 = arith.constant 0 : index
    %c0_4 = arith.constant 0 : index
    %2 = vector.load %arg4[%c0_2, %c0_3, %c0_4] : memref<1x64x128xbf16, #tpu.memory_space<vmem>>, vector<1x64x128xbf16>
    %3 = vector.shape_cast %2 : vector<1x64x128xbf16> to vector<64x128xbf16>
    %c0_5 = arith.constant 0 : index
    %c0_6 = arith.constant 0 : index
    %4 = vector.load %arg5[%c0_5, %c0_6] : memref<32x128xbf16, #tpu.memory_space<vmem>>, vector<32x128xbf16>
    %c0_7 = arith.constant 0 : index
    %c0_8 = arith.constant 0 : index
    %c0_9 = arith.constant 0 : index
    %5 = vector.load %arg8[%c0_7, %c0_8, %c0_9] : memref<1x1x64xf32, #tpu.memory_space<vmem>>, vector<1x1x64xf32>
    %6 = vector.shape_cast %5 : vector<1x1x64xf32> to vector<1x64xf32>
    %c0_10 = arith.constant 0 : index
    %c0_11 = arith.constant 0 : index
    %7 = vector.load %arg6[%c0_10, %c0_11] : memref<1x128xbf16, #tpu.memory_space<vmem>>, vector<1x128xbf16>
    %8 = vector.broadcast %7 : vector<1x128xbf16> to vector<64x128xbf16>
    %9 = arith.addf %1, %8 : vector<64x128xbf16>
    %10 = vector.extract_strided_slice %1 {offsets = [0, 0], sizes = [64, 32], strides = [1, 1]} : vector<64x128xbf16> to vector<64x32xbf16>
    %11 = vector.extract_strided_slice %9 {offsets = [0, 0], sizes = [64, 32], strides = [1, 1]} : vector<64x128xbf16> to vector<64x32xbf16>
    %c0_12 = arith.constant 0 : index
    %c0_13 = arith.constant 0 : index
    %c0_14 = arith.constant 0 : index
    %c0_15 = arith.constant 0 : index
    %12 = vector.load %arg3[%c0_12, %c0_13, %c0_14, %c0_15] : memref<1x4x32x64xbf16, #tpu.memory_space<vmem>>, vector<1x1x32x64xbf16>
    %13 = vector.shape_cast %12 : vector<1x1x32x64xbf16> to vector<32x64xbf16>
    %14 = vector.extract_strided_slice %3 {offsets = [0, 0], sizes = [64, 32], strides = [1, 1]} : vector<64x128xbf16> to vector<64x32xbf16>
    %cst = arith.constant dense<0.000000e+00> : vector<64x64xf32>
    %15 = tpu.matmul %11, %13, %cst {dimension_numbers = #tpu.dot_dimension_numbers<[1], [0], [0], [1], [0, 0, 1, 1], [], []>} : vector<64x32xbf16>, vector<32x64xbf16>, vector<64x64xf32> -> vector<64x64xf32>
    %cst_16 = arith.constant dense<0.000000e+00> : vector<64x128xf32>
    %16 = tpu.matmul %10, %4, %cst_16 {dimension_numbers = #tpu.dot_dimension_numbers<[1], [0], [0], [1], [0, 0, 1, 1], [], []>} : vector<64x32xbf16>, vector<32x128xbf16>, vector<64x128xf32> -> vector<64x128xf32>
    %c0_17 = arith.constant 0 : index
    %c0_18 = arith.constant 0 : index
    %17 = vector.load %arg7[%c0_17, %c0_18] : memref<4x128xf32, #tpu.memory_space<vmem>>, vector<1x128xf32>
    %18 = vector.broadcast %17 : vector<1x128xf32> to vector<64x128xf32>
    %19 = arith.addf %16, %18 : vector<64x128xf32>
    %c64_i32 = arith.constant 64 : i32
    %20 = tpu.dynamic_rotate %19 by %c64_i32 dim 1 {stride = 1 : si32, stride_dimension = 0 : si32} : vector<64x128xf32>, i32 -> vector<64x128xf32>
    %21 = vector.extract_strided_slice %20 {offsets = [0, 0], sizes = [64, 64], strides = [1, 1]} : vector<64x128xf32> to vector<64x64xf32>
    %22 = arith.addf %15, %21 : vector<64x64xf32>
    %23 = vector.broadcast %6 : vector<1x64xf32> to vector<64x64xf32>
    %24 = arith.addf %22, %23 : vector<64x64xf32>
    %cst_19 = arith.constant dense<0xFF800000> : vector<64xf32>
    %25 = vector.multi_reduction <maximumf>, %24, %cst_19 [1] : vector<64x64xf32> to vector<64xf32>
    %26 = vector.shape_cast %25 : vector<64xf32> to vector<64x1xf32>
    %27 = vector.broadcast %26 : vector<64x1xf32> to vector<64x64xf32>
    %28 = arith.subf %24, %27 : vector<64x64xf32>
    %29 = math.exp %28 : vector<64x64xf32>
    %cst_20 = arith.constant dense<0.000000e+00> : vector<64xf32>
    %30 = vector.multi_reduction <add>, %29, %cst_20 [1] : vector<64x64xf32> to vector<64xf32>
    %31 = vector.shape_cast %30 : vector<64xf32> to vector<64x1xf32>
    %32 = tpu.reciprocal %31 {approx = true} : vector<64x1xf32> -> vector<64x1xf32>
    %33 = vector.broadcast %32 : vector<64x1xf32> to vector<64x64xf32>
    %34 = arith.mulf %29, %33 : vector<64x64xf32>
    %35 = arith.truncf %34 : vector<64x64xf32> to vector<64x64xbf16>
    %cst_21 = arith.constant dense<0.000000e+00> : vector<64x32xf32>
    %36 = tpu.matmul %35, %14, %cst_21 {dimension_numbers = #tpu.dot_dimension_numbers<[1], [0], [0], [1], [0, 0, 1, 1], [], []>} : vector<64x64xbf16>, vector<64x32xbf16>, vector<64x32xf32> -> vector<64x32xf32>
    %37 = vector.extract_strided_slice %1 {offsets = [0, 32], sizes = [64, 32], strides = [1, 1]} : vector<64x128xbf16> to vector<64x32xbf16>
    %38 = vector.extract_strided_slice %9 {offsets = [0, 32], sizes = [64, 32], strides = [1, 1]} : vector<64x128xbf16> to vector<64x32xbf16>
    %c0_22 = arith.constant 0 : index
    %c1 = arith.constant 1 : index
    %c0_23 = arith.constant 0 : index
    %c0_24 = arith.constant 0 : index
    %39 = vector.load %arg3[%c0_22, %c1, %c0_23, %c0_24] : memref<1x4x32x64xbf16, #tpu.memory_space<vmem>>, vector<1x1x32x64xbf16>
    %40 = vector.shape_cast %39 : vector<1x1x32x64xbf16> to vector<32x64xbf16>
    %41 = vector.extract_strided_slice %3 {offsets = [0, 32], sizes = [64, 32], strides = [1, 1]} : vector<64x128xbf16> to vector<64x32xbf16>
    %cst_25 = arith.constant dense<0.000000e+00> : vector<64x64xf32>
    %42 = tpu.matmul %38, %40, %cst_25 {dimension_numbers = #tpu.dot_dimension_numbers<[1], [0], [0], [1], [0, 0, 1, 1], [], []>} : vector<64x32xbf16>, vector<32x64xbf16>, vector<64x64xf32> -> vector<64x64xf32>
    %cst_26 = arith.constant dense<0.000000e+00> : vector<64x128xf32>
    %43 = tpu.matmul %37, %4, %cst_26 {dimension_numbers = #tpu.dot_dimension_numbers<[1], [0], [0], [1], [0, 0, 1, 1], [], []>} : vector<64x32xbf16>, vector<32x128xbf16>, vector<64x128xf32> -> vector<64x128xf32>
    %c1_27 = arith.constant 1 : index
    %c0_28 = arith.constant 0 : index
    %44 = vector.load %arg7[%c1_27, %c0_28] : memref<4x128xf32, #tpu.memory_space<vmem>>, vector<1x128xf32>
    %45 = vector.broadcast %44 : vector<1x128xf32> to vector<64x128xf32>
    %46 = arith.addf %43, %45 : vector<64x128xf32>
    %c64_i32_29 = arith.constant 64 : i32
    %47 = tpu.dynamic_rotate %46 by %c64_i32_29 dim 1 {stride = 1 : si32, stride_dimension = 0 : si32} : vector<64x128xf32>, i32 -> vector<64x128xf32>
    %48 = vector.extract_strided_slice %47 {offsets = [0, 0], sizes = [64, 64], strides = [1, 1]} : vector<64x128xf32> to vector<64x64xf32>
    %49 = arith.addf %42, %48 : vector<64x64xf32>
    %50 = vector.broadcast %6 : vector<1x64xf32> to vector<64x64xf32>
    %51 = arith.addf %49, %50 : vector<64x64xf32>
    %cst_30 = arith.constant dense<0xFF800000> : vector<64xf32>
    %52 = vector.multi_reduction <maximumf>, %51, %cst_30 [1] : vector<64x64xf32> to vector<64xf32>
    %53 = vector.shape_cast %52 : vector<64xf32> to vector<64x1xf32>
    %54 = vector.broadcast %53 : vector<64x1xf32> to vector<64x64xf32>
    %55 = arith.subf %51, %54 : vector<64x64xf32>
    %56 = math.exp %55 : vector<64x64xf32>
    %cst_31 = arith.constant dense<0.000000e+00> : vector<64xf32>
    %57 = vector.multi_reduction <add>, %56, %cst_31 [1] : vector<64x64xf32> to vector<64xf32>
    %58 = vector.shape_cast %57 : vector<64xf32> to vector<64x1xf32>
    %59 = tpu.reciprocal %58 {approx = true} : vector<64x1xf32> -> vector<64x1xf32>
    %60 = vector.broadcast %59 : vector<64x1xf32> to vector<64x64xf32>
    %61 = arith.mulf %56, %60 : vector<64x64xf32>
    %62 = arith.truncf %61 : vector<64x64xf32> to vector<64x64xbf16>
    %cst_32 = arith.constant dense<0.000000e+00> : vector<64x32xf32>
    %63 = tpu.matmul %62, %41, %cst_32 {dimension_numbers = #tpu.dot_dimension_numbers<[1], [0], [0], [1], [0, 0, 1, 1], [], []>} : vector<64x64xbf16>, vector<64x32xbf16>, vector<64x32xf32> -> vector<64x32xf32>
    %64 = vector.extract_strided_slice %1 {offsets = [0, 64], sizes = [64, 32], strides = [1, 1]} : vector<64x128xbf16> to vector<64x32xbf16>
    %65 = vector.extract_strided_slice %9 {offsets = [0, 64], sizes = [64, 32], strides = [1, 1]} : vector<64x128xbf16> to vector<64x32xbf16>
    %c0_33 = arith.constant 0 : index
    %c2 = arith.constant 2 : index
    %c0_34 = arith.constant 0 : index
    %c0_35 = arith.constant 0 : index
    %66 = vector.load %arg3[%c0_33, %c2, %c0_34, %c0_35] : memref<1x4x32x64xbf16, #tpu.memory_space<vmem>>, vector<1x1x32x64xbf16>
    %67 = vector.shape_cast %66 : vector<1x1x32x64xbf16> to vector<32x64xbf16>
    %68 = vector.extract_strided_slice %3 {offsets = [0, 64], sizes = [64, 32], strides = [1, 1]} : vector<64x128xbf16> to vector<64x32xbf16>
    %cst_36 = arith.constant dense<0.000000e+00> : vector<64x64xf32>
    %69 = tpu.matmul %65, %67, %cst_36 {dimension_numbers = #tpu.dot_dimension_numbers<[1], [0], [0], [1], [0, 0, 1, 1], [], []>} : vector<64x32xbf16>, vector<32x64xbf16>, vector<64x64xf32> -> vector<64x64xf32>
    %cst_37 = arith.constant dense<0.000000e+00> : vector<64x128xf32>
    %70 = tpu.matmul %64, %4, %cst_37 {dimension_numbers = #tpu.dot_dimension_numbers<[1], [0], [0], [1], [0, 0, 1, 1], [], []>} : vector<64x32xbf16>, vector<32x128xbf16>, vector<64x128xf32> -> vector<64x128xf32>
    %c2_38 = arith.constant 2 : index
    %c0_39 = arith.constant 0 : index
    %71 = vector.load %arg7[%c2_38, %c0_39] : memref<4x128xf32, #tpu.memory_space<vmem>>, vector<1x128xf32>
    %72 = vector.broadcast %71 : vector<1x128xf32> to vector<64x128xf32>
    %73 = arith.addf %70, %72 : vector<64x128xf32>
    %c64_i32_40 = arith.constant 64 : i32
    %74 = tpu.dynamic_rotate %73 by %c64_i32_40 dim 1 {stride = 1 : si32, stride_dimension = 0 : si32} : vector<64x128xf32>, i32 -> vector<64x128xf32>
    %75 = vector.extract_strided_slice %74 {offsets = [0, 0], sizes = [64, 64], strides = [1, 1]} : vector<64x128xf32> to vector<64x64xf32>
    %76 = arith.addf %69, %75 : vector<64x64xf32>
    %77 = vector.broadcast %6 : vector<1x64xf32> to vector<64x64xf32>
    %78 = arith.addf %76, %77 : vector<64x64xf32>
    %cst_41 = arith.constant dense<0xFF800000> : vector<64xf32>
    %79 = vector.multi_reduction <maximumf>, %78, %cst_41 [1] : vector<64x64xf32> to vector<64xf32>
    %80 = vector.shape_cast %79 : vector<64xf32> to vector<64x1xf32>
    %81 = vector.broadcast %80 : vector<64x1xf32> to vector<64x64xf32>
    %82 = arith.subf %78, %81 : vector<64x64xf32>
    %83 = math.exp %82 : vector<64x64xf32>
    %cst_42 = arith.constant dense<0.000000e+00> : vector<64xf32>
    %84 = vector.multi_reduction <add>, %83, %cst_42 [1] : vector<64x64xf32> to vector<64xf32>
    %85 = vector.shape_cast %84 : vector<64xf32> to vector<64x1xf32>
    %86 = tpu.reciprocal %85 {approx = true} : vector<64x1xf32> -> vector<64x1xf32>
    %87 = vector.broadcast %86 : vector<64x1xf32> to vector<64x64xf32>
    %88 = arith.mulf %83, %87 : vector<64x64xf32>
    %89 = arith.truncf %88 : vector<64x64xf32> to vector<64x64xbf16>
    %cst_43 = arith.constant dense<0.000000e+00> : vector<64x32xf32>
    %90 = tpu.matmul %89, %68, %cst_43 {dimension_numbers = #tpu.dot_dimension_numbers<[1], [0], [0], [1], [0, 0, 1, 1], [], []>} : vector<64x64xbf16>, vector<64x32xbf16>, vector<64x32xf32> -> vector<64x32xf32>
    %91 = vector.extract_strided_slice %1 {offsets = [0, 96], sizes = [64, 32], strides = [1, 1]} : vector<64x128xbf16> to vector<64x32xbf16>
    %92 = vector.extract_strided_slice %9 {offsets = [0, 96], sizes = [64, 32], strides = [1, 1]} : vector<64x128xbf16> to vector<64x32xbf16>
    %c0_44 = arith.constant 0 : index
    %c3 = arith.constant 3 : index
    %c0_45 = arith.constant 0 : index
    %c0_46 = arith.constant 0 : index
    %93 = vector.load %arg3[%c0_44, %c3, %c0_45, %c0_46] : memref<1x4x32x64xbf16, #tpu.memory_space<vmem>>, vector<1x1x32x64xbf16>
    %94 = vector.shape_cast %93 : vector<1x1x32x64xbf16> to vector<32x64xbf16>
    %95 = vector.extract_strided_slice %3 {offsets = [0, 96], sizes = [64, 32], strides = [1, 1]} : vector<64x128xbf16> to vector<64x32xbf16>
    %cst_47 = arith.constant dense<0.000000e+00> : vector<64x64xf32>
    %96 = tpu.matmul %92, %94, %cst_47 {dimension_numbers = #tpu.dot_dimension_numbers<[1], [0], [0], [1], [0, 0, 1, 1], [], []>} : vector<64x32xbf16>, vector<32x64xbf16>, vector<64x64xf32> -> vector<64x64xf32>
    %cst_48 = arith.constant dense<0.000000e+00> : vector<64x128xf32>
    %97 = tpu.matmul %91, %4, %cst_48 {dimension_numbers = #tpu.dot_dimension_numbers<[1], [0], [0], [1], [0, 0, 1, 1], [], []>} : vector<64x32xbf16>, vector<32x128xbf16>, vector<64x128xf32> -> vector<64x128xf32>
    %c3_49 = arith.constant 3 : index
    %c0_50 = arith.constant 0 : index
    %98 = vector.load %arg7[%c3_49, %c0_50] : memref<4x128xf32, #tpu.memory_space<vmem>>, vector<1x128xf32>
    %99 = vector.broadcast %98 : vector<1x128xf32> to vector<64x128xf32>
    %100 = arith.addf %97, %99 : vector<64x128xf32>
    %c64_i32_51 = arith.constant 64 : i32
    %101 = tpu.dynamic_rotate %100 by %c64_i32_51 dim 1 {stride = 1 : si32, stride_dimension = 0 : si32} : vector<64x128xf32>, i32 -> vector<64x128xf32>
    %102 = vector.extract_strided_slice %101 {offsets = [0, 0], sizes = [64, 64], strides = [1, 1]} : vector<64x128xf32> to vector<64x64xf32>
    %103 = arith.addf %96, %102 : vector<64x64xf32>
    %104 = vector.broadcast %6 : vector<1x64xf32> to vector<64x64xf32>
    %105 = arith.addf %103, %104 : vector<64x64xf32>
    %cst_52 = arith.constant dense<0xFF800000> : vector<64xf32>
    %106 = vector.multi_reduction <maximumf>, %105, %cst_52 [1] : vector<64x64xf32> to vector<64xf32>
    %107 = vector.shape_cast %106 : vector<64xf32> to vector<64x1xf32>
    %108 = vector.broadcast %107 : vector<64x1xf32> to vector<64x64xf32>
    %109 = arith.subf %105, %108 : vector<64x64xf32>
    %110 = math.exp %109 : vector<64x64xf32>
    %cst_53 = arith.constant dense<0.000000e+00> : vector<64xf32>
    %111 = vector.multi_reduction <add>, %110, %cst_53 [1] : vector<64x64xf32> to vector<64xf32>
    %112 = vector.shape_cast %111 : vector<64xf32> to vector<64x1xf32>
    %113 = tpu.reciprocal %112 {approx = true} : vector<64x1xf32> -> vector<64x1xf32>
    %114 = vector.broadcast %113 : vector<64x1xf32> to vector<64x64xf32>
    %115 = arith.mulf %110, %114 : vector<64x64xf32>
    %116 = arith.truncf %115 : vector<64x64xf32> to vector<64x64xbf16>
    %cst_54 = arith.constant dense<0.000000e+00> : vector<64x32xf32>
    %117 = tpu.matmul %116, %95, %cst_54 {dimension_numbers = #tpu.dot_dimension_numbers<[1], [0], [0], [1], [0, 0, 1, 1], [], []>} : vector<64x64xbf16>, vector<64x32xbf16>, vector<64x32xf32> -> vector<64x32xf32>
    %118 = tpu.concatenate %36, %63, %90, %117 in 1 : vector<64x32xf32>, vector<64x32xf32>, vector<64x32xf32>, vector<64x32xf32> -> vector<64x128xf32>
    %c0_55 = arith.constant 0 : index
    %c0_56 = arith.constant 0 : index
    %c0_57 = arith.constant 0 : index
    %119 = vector.load %arg9[%c0_55, %c0_56, %c0_57] : memref<1x64x128xf32, #tpu.memory_space<vmem>>, vector<1x64x128xf32>
    %120 = vector.shape_cast %119 : vector<1x64x128xf32> to vector<64x128xf32>
    %121 = vector.shape_cast %118 : vector<64x128xf32> to vector<1x64x128xf32>
    tpu.vector_store %arg9[%c0_55, %c0_56, %c0_57], %121 {strides = array<i32>} : memref<1x64x128xf32, #tpu.memory_space<vmem>>, vector<1x64x128xf32>,
    return
  }
  func.func @transform_0(%arg0: i32, %arg1: i32) -> (i32, i32, i32) {
    %c0_i32 = arith.constant 0 : i32
    %c0_i32_0 = arith.constant 0 : i32
    return %arg0, %arg1, %c0_i32 : i32, i32, i32
  }
  func.func @transform_1(%arg0: i32, %arg1: i32) -> (i32, i32, i32, i32) {
    %c0_i32 = arith.constant 0 : i32
    %c0_i32_0 = arith.constant 0 : i32
    %c0_i32_1 = arith.constant 0 : i32
    %c0_i32_2 = arith.constant 0 : i32
    return %arg0, %c0_i32, %c0_i32_0, %c0_i32_1 : i32, i32, i32, i32
  }
  func.func @transform_2(%arg0: i32, %arg1: i32) -> (i32, i32, i32) {
    %c0_i32 = arith.constant 0 : i32
    %c0_i32_0 = arith.constant 0 : i32
    %c0_i32_1 = arith.constant 0 : i32
    return %arg0, %c0_i32, %c0_i32_0 : i32, i32, i32
  }
  func.func @transform_3(%arg0: i32, %arg1: i32) -> (i32, i32) {
    %c0_i32 = arith.constant 0 : i32
    %c0_i32_0 = arith.constant 0 : i32
    %c0_i32_1 = arith.constant 0 : i32
    return %c0_i32, %c0_i32_0 : i32, i32
  }
  func.func @transform_4(%arg0: i32, %arg1: i32) -> (i32, i32) {
    %c0_i32 = arith.constant 0 : i32
    %c0_i32_0 = arith.constant 0 : i32
    %c0_i32_1 = arith.constant 0 : i32
    return %c0_i32, %c0_i32_0 : i32, i32
  }
  func.func @transform_5(%arg0: i32, %arg1: i32) -> (i32, i32) {
    %c0_i32 = arith.constant 0 : i32
    %c0_i32_0 = arith.constant 0 : i32
    %c0_i32_1 = arith.constant 0 : i32
    return %c0_i32, %c0_i32_0 : i32, i32
  }
  func.func @transform_6(%arg0: i32, %arg1: i32) -> (i32, i32, i32) {
    %c0_i32 = arith.constant 0 : i32
    %c0_i32_0 = arith.constant 0 : i32
    %c0_i32_1 = arith.constant 0 : i32
    return %arg0, %c0_i32, %c0_i32_0 : i32, i32, i32
  }
  func.func @transform_7(%arg0: i32, %arg1: i32) -> (i32, i32, i32) {
    %c0_i32 = arith.constant 0 : i32
    %c0_i32_0 = arith.constant 0 : i32
    return %arg0, %arg1, %c0_i32 : i32, i32, i32
  }
}

</mosaic_0001>

<bundles_post_ra>
// kernel: tpu_custom_call.1
= control target key start
LH: loop header
LB: loop body
LE: loop exit
PB: predicated region body
PF: predicated region fallthrough
CT: control target
= control target key end

     0   :  { %s3815_s0 = inlined_call_operand.hbm [shape: bf16[2,64,128], index: 0, kind: input, shape index: {}]   ;;  %s3816_s1 = inlined_call_operand.hbm [shape: bf16[2,4,32,64], index: 1, kind: input, shape index: {}]   ;;  %s3817_s2 = inlined_call_operand.hbm [shape: bf16[2,64,128], index: 2, kind: input, shape index: {}]   ;;  %s3818_s3 = inlined_call_operand.hbm [shape: bf16[32,128], index: 3, kind: input, shape index: {}]   ;;  %s3819_s4 = inlined_call_operand.hbm [shape: bf16[1,128], index: 4, kind: input, shape index: {}]   ;;  %s3820_s5 = inlined_call_operand.vmem [shape: f32[4,128], index: 5, kind: input, shape index: {}]   ;;  %s3821_s6 = inlined_call_operand.hbm [shape: f32[2,1,64], index: 6, kind: input, shape index: {}]   ;;  %s3822_s7 = inlined_call_operand.hbm [shape: f32[2,64,128], index: 7, kind: output, shape index: {}]  }
   0x1   :  { %3835 = sst [smem:[#allocation26_spill]] %s3815_s0 }
   0x2   :  { %3836 = sst [smem:[#allocation27_spill]] %s3816_s1 }
   0x3   :  { %3837 = sst [smem:[#allocation28_spill]] %s3818_s3 }
   0x4   :  { %12 = vsyncpa [#allocation3], 0 }
   0x5   :  { %14 = vsyncpa [#allocation3 + $0x1], 0 }
   0x6   :  { %15 = vsyncpa [#allocation6], 0 }
   0x7   :  { %17 = vsyncpa [#allocation6 + $0x1], 0 }
   0x8   :  { %18 = vsyncpa [#allocation9], 0 }
   0x9   :  { %19 = vsyncpa [#allocation12], 0 }
   0xa   :  { %21 = vsyncpa [#allocation12 + $0x1], 0 }
   0xb   :  { %22 = vsyncpa [#allocation4], 0 }
   0xc   :  { %24 = vsyncpa [#allocation4 + $0x1], 0  ;;  %s2858_s24 = smov 0   ;;  %s2860_s25 = smov 0  }
   0xd   :  { %s2862_s26 = smov 0   ;;  %s2864_s27 = smov 0  }
   0xe   :  { %s2866_s28 = smov 0   ;;  %s2868_s29 = smov 0  }
   0xf LB: > { %3838 = sst [smem:[#allocation19_spill]] %s2779_s24  ;;  %s2889_s30 = sadd.s32 4294967295, %s2799_s29   ;;  %s2799_s29 = sphi %s2868_s29, %s30_s29   ;;  %s2795_s28 = sphi %s2866_s28, %s3867_s28   ;;  %s2791_s27 = sphi %s2864_s27, %s3866_s27   ;;  %s2787_s26 = sphi %s2862_s26, %s3862_s26   ;;  %s2783_s25 = sphi %s2860_s25, %s3865_s25   ;;  %s2779_s24 = sphi %s2858_s24, %s3864_s24  }
  0x10   : > { %3839 = sst [smem:[#allocation20_spill]] %s2787_s26  ;;  %s2094_s8 = sadd.s32 4294967294, %s2799_s29  }
  0x11   : > { %3840 = sst [smem:[#allocation21_spill]] %s2799_s29  ;;  %p64_p0 = scmp.ne.s32.totalorder %s2783_s25, %s2779_s24 }
  0x12   : > { %p65_p1 = scmp.eq.s32.totalorder %s2889_s30, 0  ;;  %p231_p2 = scmp.eq.s32.totalorder %s2889_s30, 1 }
  0x13   : > { %p237_p3 = scmp.eq.s32.totalorder %s2094_s8, 1  ;;  %p2095_p5 = scmp.ge.s32.totalorder %s2799_s29, 1 }
  0x14   : > { %p2898_p4 = por %p65_p1, %p64_p0  ;;  %p244_p7 = scmp.lt.s32.totalorder %s2799_s29, 3 }
  0x15   : > { %p2903_p6 = por %p237_p3, %p64_p0  ;;  %s3844_s3 = sld [smem:[#allocation28_spill]] }
  0x16   : > { %p2911_p8 = pnand %p2095_p5, %p244_p7  ;;  %s2801_s15 = smov [#allocation8]  }
  0x17   : > { %s3842_s10 = scalar_select %p2903_p6, 1, 0 }
  0x18   : > { %p2292_p9 = pneg %p2911_p8  ;;  %s257_s16 = sshll.u32 %s2801_s15, 4  ;;  %s258_s16 = int_to_ptr.vmem [resolvable:$true] %s257_s16 }
  0x19   : > { %3843 = sst [smem:[#allocation22_spill]] %s3842_s10  ;;  %s3823_s18 = smov 64  }
  0x1a   : > { %p2919_p10 = pnand %p2292_p9, %p65_p1  ;;  %s3825_s19 = smov 4  }
  0x1b   : > { %s255_s13 = sshll.u32 %s3844_s3, 4  ;;  %s42_s20 = sadd.s32 1, %s2795_s28  ;;  %s256_s13 = int_to_ptr.hbm [resolvable:$true] %s255_s13 }
  0x1c   : > { %2295 = dma.hbm_to_vmem [thread:$0]  (!%p2919_p10), %s256_s13, 256, %s258_s16, [#allocation9], %s3823_s18, %s3823_s18, %s3825_s19  }
  0x1d   : > { %p44_p12 = scmp.ge.s32.totalorder %s42_s20, 2  ;;  %s51_s21 = sadd.s32 1, %s2787_s26 }
  0x1e   : > { %p58_p13 = scmp.ne.s32.totalorder %s2787_s26, %s2783_s25  ;;  %p59_p0 = scmp.eq.s32.totalorder %s2799_s29, 0 }
  0x1f   : > { %s3869_s20 = smov (%p44_p12, %s42_s20), 0  ;;  %p2318_p7 = scmp.lt.s32.totalorder %s2799_s29, 2 }
  0x20   : > { %3847 = sst [smem:[#allocation23_spill]] %s3869_s20  ;;  %p60_p3 = por %p59_p0, %p58_p13 }
  0x21   : > { %p2938_p5 = por %p231_p2, %p58_p13  ;;  %s46_s23 = ssub.s32 %s2795_s28, %s3869_s20 }
  0x22   : > { %p49_p9 = scmp.eq.s32.totalorder %s46_s23, 0  ;;  %s2946_s8 = sand.u32 1, %s2787_s26  }
  0x23   : > { %s3848_s22 = scalar_select %p2938_p5, 1, 0 }
  0x24   : > { %p2948_p11 = pnand %p2318_p7, %p60_p3  ;;  %s310_s12 = sand.u32 1, %s2799_s29  }
  0x25   : > { %3849 = sst [smem:[#allocation24_spill]] %s3848_s22  ;;  %s2102_s15 = sshll.u32 %s2946_s8, 6 }
  0x26   : > { %s2954_s13 = scalar_select %p49_p9, %s2787_s26, %s51_s21  }
  0x27   : > { %s2253_s16 = sshll.u32 %s2795_s28, 6  ;;  %s3852_s1 = sld [smem:[#allocation27_spill]] }
  0x28   : > { %3851 = sst [smem:[#allocation25_spill]] %s2954_s13  ;;  %s314_s20 = scalar_lea.vmem [#allocation5], %s2102_s15 }
  0x29   : > { %s322_s10 = sshll.u32 %s314_s20, 4  ;;  %s311_s24 = scalar_lea.sflag [#allocation6], %s310_s12  ;;  %s323_s10 = int_to_ptr.vmem [resolvable:$true] %s322_s10 }
  0x2a   : > { %s3853_s22 = smov 4   ;;  %s3854_s29 = smov 64  }
  0x2b   : > { %s270_s26 = sshll.u32 %s3819_s4, 4  ;;  %s2804_s18 = smov [#allocation10]   ;;  %s271_s26 = int_to_ptr.hbm [resolvable:$true] %s270_s26 }
  0x2c   : > { %s272_s19 = sshll.u32 %s2804_s18, 4  ;;  %s2099_s20 = sshll.u32 %s2946_s8, 5  ;;  %s273_s19 = int_to_ptr.vmem [resolvable:$true] %s272_s19 }
  0x2d   : > { %s319_s23 = scalar_lea.hbm %s3852_s1, %s2253_s16  ;;  %s2252_s12 = sshll.u32 %s2795_s28, 5 }
  0x2e   : > { %s320_s3 = sshll.u32 %s319_s23, 4  ;;  %s3855_s0 = sld [smem:[#allocation26_spill]]  ;;  %s321_s3 = int_to_ptr.hbm [resolvable:$true] %s320_s3 }
  0x2f   : > { %2305 = dma.hbm_to_vmem [thread:$0]  (!%p2948_p11), %s321_s3, 1024, %s323_s10, %s311_s24, %s3854_s29, %s3854_s29, %s3853_s22  }
  0x30   : > { %2298 = dma.hbm_to_vmem [thread:$0]  (!%p2919_p10), %s271_s26, 16, %s273_s19, [#allocation9]  }
  0x31   : > { %s290_s10 = scalar_lea.vmem [#allocation2], %s2099_s20  ;;  %s287_s21 = scalar_lea.sflag [#allocation3], %s2946_s8 }
  0x32   : > { %s300_s13 = sshll.u32 %s290_s10, 4  ;;  %s341_s18 = scalar_lea.hbm %s3817_s2, %s2252_s12  ;;  %s301_s13 = int_to_ptr.vmem [resolvable:$true] %s300_s13 }
  0x33   : > { %s342_s19 = sshll.u32 %s341_s18, 4  ;;  %s336_s15 = scalar_lea.vmem [#allocation7], %s2099_s20  ;;  %s343_s19 = int_to_ptr.hbm [resolvable:$true] %s342_s19 }
  0x34   : > { %s297_s23 = scalar_lea.hbm %s3855_s0, %s2252_s12  ;;  %s344_s16 = sshll.u32 %s336_s15, 4  ;;  %s345_s16 = int_to_ptr.vmem [resolvable:$true] %s344_s16 }
  0x35   : > { %s298_s3 = sshll.u32 %s297_s23, 4  ;;  %s360_s0 = scalar_lea.hbm %s3821_s6, %s2795_s28  ;;  %s299_s3 = int_to_ptr.hbm [resolvable:$true] %s298_s3 }
  0x36   : > { %2302 = dma.hbm_to_vmem [thread:$0]  (!%p2948_p11), %s299_s3, 512, %s301_s13, %s287_s21, %s3854_s29, %s3854_s29, %s3853_s22  }
  0x37   : > { %2308 = dma.hbm_to_vmem [thread:$0]  (!%p2948_p11), %s343_s19, 512, %s345_s16, %s311_s24, %s3854_s29, %s3854_s29, %s3853_s22  }
  0x38   : > { %s357_s1 = scalar_lea.vmem [#allocation11], %s2946_s8  ;;  %s362_s13 = sshll.u32 %s360_s0, 4  ;;  %s363_s13 = int_to_ptr.hbm [resolvable:$true] %s362_s13 }
  0x39   : > { %s364_s3 = sshll.u32 %s357_s1, 4  ;;  %s355_s12 = scalar_lea.sflag [#allocation12], %s2946_s8  ;;  %s365_s3 = int_to_ptr.vmem [resolvable:$true] %s364_s3 }
  0x3a   : > { %2311 = dma.hbm_to_vmem [thread:$0]  (!%p2948_p11), %s363_s13, 16, %s365_s3, %s355_s12  }
  0x3b   : > { %373 = sbr.rel (%p2911_p8) target bundleno = 2003 (0x7d3), region = 48  ;;  %s3001_s20 = sand.u32 (!%p2911_p8), 1, %s2783_s25  }
  0x3c   : > { %s2109_s24 = sshll.u32 (!%p2911_p8), %s3001_s20, 5  ;;  %s376_s29 = scalar_lea.sflag (!%p2911_p8), [#allocation3], %s3001_s20 }
  0x3d   : > { %s3005_s22 = scalar_lea.vmem (!%p2911_p8), [#allocation2], %s2109_s24 }
  0x40   : > { %2758 = dma.done.wait (%p2898_p4), %s376_s29, 512  }
  0x41   : > { %2760 = vsyncadd (%p2898_p4), %s376_s29, 4294966784  ;;  %s385_s0 = sand.u32 1, %s2889_s30   ;;  %s2110_s1 = sshll.u32 %s3001_s20, 6 }
  0x42   : > { %s386_s14 = scalar_lea.sflag [#allocation6], %s385_s0  ;;  %s3015_s8 = scalar_lea.vmem [#allocation5], %s2110_s1 }
  0x43   : > { %2762 = dma.done.wait (%p2898_p4), %s386_s14, 1536  }
  0x44   : > { %2764 = vsyncadd (%p2898_p4), %s386_s14, 4294965760  ;;  %s3021_s11 = scalar_lea.vmem [#allocation7], %s2109_s24 }
  0x45   : > { %2766 = dma.done.wait (%p65_p1), [#allocation9], 272  }
  0x46   : > { %2768 = vsyncadd (%p65_p1), [#allocation9], 4294967024  ;;  %s416_s21 = scalar_lea.sflag [#allocation12], %s3001_s20  ;;  %s418_s26 = scalar_lea.vmem [#allocation11], %s3001_s20 }
  0x47   : > { %2770 = dma.done.wait (%p2898_p4), %s416_s21, 16  }
  0x48   : > { %2772 = vsyncadd (%p2898_p4), %s416_s21, 4294967280  ;;  %v3033_v0 = vld [vmem:[#allocation8 + $0x8] sm:$0xff]  ;;  %v3036_v1 = vld [vmem:[%s3005_s22] sm:$0xff]  ;;  %s2805_s30 = smov 96   ;;  %vm556_vm0 = vcmask 261120   ;;  %s2806_s18 = smov 320  }
  0x49   : > { %v3038_v2 = vld [vmem:[#allocation8] sm:$0xff]  ;;  %v3041_v3 = vld [vmem:[%s3005_s22 + $0x10] sm:$0xff]  ;;  %575 = vmatpush.bf16.msra.mxu0 %v3033_v0  ;;  %879 = vrot.lane.b32.xlu0 %v3036_v1, %s2805_s30  ;;  %v3051_v4 = vld [vmem:[%s3005_s22 + $0x8] sm:$0xff]  ;;  %s2807_s19 = smov 328   ;;  %s2808_s15 = smov 336   ;;  %vm714_vm1 = vcmask 523264  }
  0x4a   : > { %883 = vrot.lane.b32.xlu1 %v3041_v3, %s2805_s30  ;;  %905 = vmatpush.bf16.msra.mxu3 %v3033_v0  ;;  %v3058_v5 = vld [vmem:[%s3005_s22 + $0x18] sm:$0xff]  ;;  %v488_v6 = vld [vmem:[#allocation10] sm:$0x1]  ;;  %v467_v7 = vld [vmem:[%s3005_s22] sm:$0xff]   ;;  %s2809_s16 = smov 344   ;;  %s2810_s23 = smov 352  }
  0x4b   : > { %885 = vrot.lane.b32.xlu2 %v3058_v5, %s2805_s30  ;;  %v490_v8 = vpack.i.b16 %v488_v6, %v488_v6  ;;  %v2266_v9 = vld [vmem:[%s3015_s8 + $0x8] sm:$0xff]  ;;  %v471_v10 = vld [vmem:[%s3005_s22 + $0x10] sm:$0xff]   ;;  %v493_v11 = vunpack.c.l.bf16 %v467_v7  ;;  %v473_v12 = vld [vmem:[%s3005_s22 + $0x18] sm:$0xff]   ;;  %v494_v14 = vunpack.c.h.bf16 %v467_v7  ;;  %s2811_s10 = smov 360   ;;  %s2812_s3 = smov 368   ;;  %vm1890_vm2 = vcmask 785408  }
  0x4c   : > { %680 = vmatpush.bf16.msra.mxu1 %v2266_v9  ;;  %v497_v15 = vunpack.c.l.bf16 %v471_v10  ;;  %v498_v16 = vunpack.c.h.bf16 %v471_v10  ;;  %v2265_v17 = vld [vmem:[%s3015_s8] sm:$0xff]  ;;  %v469_v18 = vld [vmem:[%s3005_s22 + $0x8] sm:$0xff]   ;;  %v499_v19 = vunpack.c.l.bf16 %v473_v12  ;;  %v500_v20 = vunpack.c.h.bf16 %v473_v12  ;;  %v2261_v52 = vld [vmem:[%s3021_s11 + $0x10] sm:$0xff]  ;;  %s2813_s13 = smov 376   ;;  %s2814_s29 = smov 64  }
  0x4d   : > { %576 = vmatpush.bf16.msra.mxu0 %v3038_v2  ;;  %v492_v13 = vperm.slane %v490_v8, 0  ;;  %v495_v21 = vunpack.c.l.bf16 %v469_v18  ;;  %v496_v22 = vunpack.c.h.bf16 %v469_v18  ;;  %v2260_v53 = vld [vmem:[%s3021_s11 + $0x8] sm:$0xff]  ;;  %v2262_v54 = vld [vmem:[%s3021_s11 + $0x18] sm:$0xff]  ;;  %v2259_v55 = vld [vmem:[%s3021_s11] sm:$0xff]  ;;  %s2815_s22 = smov 32  }
  0x4e   : > { %906 = vmatpush.bf16.msra.mxu3 %v3038_v2  ;;  %847 = vmatpush.bf16.msra.mxu2 %v2262_v54  ;;  %v2387_v58 = vld [vmem:[%s3820_s5] ss:$0 sm:$0xff]  ;;  %v2268_v6 = vld [vmem:[%s3015_s8 + $0x18] sm:$0xff]  ;;  %v2267_v7 = vld [vmem:[%s3015_s8 + $0x10] sm:$0xff] }
  0x4f   : > { %v501_v23 = vunpack.c.l.bf16 %v492_v13 }
  0x50   : > { %2139 = vmatmul.msk.bf16.vlgmr.msra.gmra.mxu0 %vm556_vm0, %v3036_v1  ;;  %681 = vmatpush.bf16.msra.mxu1 %v2265_v17 }
  0x51   : > { %881 = vrot.lane.b32.xlu0 %v3051_v4, %s2805_s30  ;;  %v502_v24 = vadd.f32 %v501_v23, %v493_v11  ;;  %v503_v25 = vadd.f32 %v501_v23, %v494_v14  ;;  %v506_v26 = vadd.f32 %v501_v23, %v497_v15  ;;  %v507_v27 = vadd.f32 %v501_v23, %v498_v16 }
  0x52   : > { %1207 = vmatpush.bf16.msrb.mxu3 %v3033_v0  ;;  %v508_v28 = vadd.f32 %v501_v23, %v499_v19  ;;  %v509_v29 = vadd.f32 %v501_v23, %v500_v20  ;;  %v504_v30 = vadd.f32 %v501_v23, %v495_v21  ;;  %v505_v31 = vadd.f32 %v501_v23, %v496_v22 }
  0x53   : > { %v510_v32 = vpack.c.bf16 %v502_v24, %v502_v24  ;;  %v511_v33 = vpack.c.bf16 %v503_v25, %v503_v25  ;;  %v514_v34 = vpack.c.bf16 %v506_v26, %v506_v26  ;;  %v515_v35 = vpack.c.bf16 %v507_v27, %v507_v27  ;;  %848 = vmatpush.bf16.msra.mxu2 %v2261_v52 }
  0x54   : > { %v516_v36 = vpack.c.bf16 %v508_v28, %v508_v28  ;;  %v517_v37 = vpack.c.bf16 %v509_v29, %v509_v29  ;;  %v512_v38 = vpack.c.bf16 %v504_v30, %v504_v30  ;;  %v513_v39 = vpack.c.bf16 %v505_v31, %v505_v31  ;;  %998 = vmatpush.bf16.msrb.mxu0 %v2268_v6  ;;  %v3134_v29 = vld [vmem:[%s418_s26] ss:$0 sm:$0xff] }
  0x55   : > { %v638_v40 = vunpack.c.l.b16 %v510_v32  ;;  %v639_v41 = vunpack.c.l.b16 %v511_v33  ;;  %v642_v42 = vunpack.c.l.b16 %v514_v34  ;;  %v643_v43 = vunpack.c.l.b16 %v515_v35 }
  0x56   : > { %1208 = vmatpush.bf16.msrb.mxu3 %v3038_v2  ;;  %v640_v44 = vunpack.c.l.b16 %v512_v38  ;;  %v641_v45 = vunpack.c.l.b16 %v513_v39  ;;  %v644_v49 = vunpack.c.l.b16 %v516_v36  ;;  %v645_v50 = vunpack.c.l.b16 %v517_v37 }
  0x57   : > { %v3073_v46 = vpack.c.b16 %v639_v41, %v638_v40  ;;  %v3075_v47 = vpack.c.b16 %v643_v43, %v642_v42  ;;  %849 = vmatpush.bf16.msra.mxu2 %v2260_v53 }
  0x58   : > { %v3077_v48 = vpack.c.b16 %v641_v45, %v640_v44  ;;  %v3089_v51 = vpack.c.b16 %v645_v50, %v644_v49  ;;  %999 = vmatpush.bf16.msrb.mxu0 %v2267_v7 }
  0x59   : > { %960 = vrot.lane.b32.xlu1 %v3073_v46, %s2805_s30  ;;  %964 = vrot.lane.b32.xlu0 %v3075_v47, %s2805_s30 }
  0x5a   : > { %2151 = vmatmul.msk.bf16.vlgmr.msra.gmra.mxu1 %vm556_vm0, %v3073_v46  ;;  %962 = vrot.lane.b32.xlu2 %v3077_v48, %s2805_s30 }
  0x5b   : > { %850 = vmatpush.bf16.msra.mxu2 %v2259_v55 }
  0x60   : > { %2140 = vmatmul.msk.bf16.gmra.mxu0 %vm556_vm0, %v3051_v4 }
  0x61   : > { %966 = vrot.lane.b32.xlu1 %v3089_v51, %s2805_s30  ;;  %1125 = vrot.lane.b32.xlu0 %v2261_v52, %s2805_s30 }
  0x62   : > { %1127 = vrot.lane.b32.xlu2 %v2262_v54, %s2805_s30 }
  0x69   : > { %1123 = vrot.lane.b32.xlu1 %v2260_v53, %s2805_s30 }
  0x6a   : > { %2152 = vmatmul.msk.bf16.gmra.mxu1 %vm556_vm0, %v3077_v48  ;;  %1121 = vrot.lane.b32.xlu2 %v2259_v55, %s2805_s30 }
  0x70   : > { %2141 = vmatmul.msk.bf16.gmra.mxu0 %vm556_vm0, %v3041_v3 }
  0x7a   : > { %2153 = vmatmul.msk.bf16.gmra.mxu1 %vm556_vm0, %v3075_v47 }
  0x80   : > { %2142 = vmatmul.msk.bf16.gmra.mxu0 %vm556_vm0, %v3058_v5 }
  0x8a   : > { %2154 = vmatmul.msk.bf16.gmra.mxu1 %vm556_vm0, %v3089_v51 }
  0xa5   : > { %v886_v11 = vpop.permute.xlu2 %885 }
  0xb4   : > { %v963_v16 = vpop.permute.xlu2 %962 }
  0xbb   : > { %v880_v56 = vpop.permute.xlu0 %879 }
  0xbc   : > { %2179 = vmatmul.msk.bf16.vlgmr.msra.gmra.mxu3 %vm556_vm0, %v880_v56  ;;  %v884_v63 = vpop.permute.xlu1 %883  ;;  %v1128_v21 = vpop.permute.xlu2 %1127 }
  0xbd   : > { %1149 = vmatpush.bf16.msrb.mxu1 %v1128_v21 }
  0xc3   : > { %v882_v57 = vpop.permute.xlu0 %881 }
  0xc4   : > { %v1122_v26 = vpop.permute.xlu2 %1121 }
  0xcb   : > { %v961_v10 = vpop.permute.xlu1 %960  ;;  %v965_v17 = vpop.permute.xlu0 %964 }
  0xcc   : > { %2180 = vmatmul.msk.bf16.gmra.mxu3 %vm556_vm0, %v882_v57  ;;  %2191 = vmatmul.msk.bf16.vlgmr.msrb.gmra.mxu0 %vm556_vm0, %v961_v10 }
  0xcd   : > { %v578_v59 = vpop.f32.mrf.mxu0 }
  0xce   : > { %v579_v60 = vadd.f32 %v2387_v58, %v578_v59 }
  0xd0   : > { %600 = vrot.lane.b32.xlu2 %v579_v60, %s2806_s18 }
  0xd3   : > { %v967_v18 = vpop.permute.xlu1 %966  ;;  %v1126_v22 = vpop.permute.xlu0 %1125 }
  0xd4   : > { %1150 = vmatpush.bf16.msrb.mxu1 %v1126_v22 }
  0xd5   : > { %v580_v61 = vpop.f32.mrf.mxu0 }
  0xd6   : > { %v581_v62 = vadd.f32 %v2387_v58, %v580_v61 }
  0xd7   : > { %v683_v30 = vpop.f32.mrf.mxu1 }
  0xd8   : > { %604 = vrot.lane.b32.xlu0 %v581_v62, %s2807_s19 }
  0xdb   : > { %v1124_v25 = vpop.permute.xlu1 %1123 }
  0xdc   : > { %2181 = vmatmul.msk.bf16.gmra.mxu3 %vm556_vm0, %v884_v63  ;;  %2192 = vmatmul.msk.bf16.gmra.mxu0 %vm556_vm0, %v963_v16 }
  0xdd   : > { %v583_v8 = vpop.f32.mrf.mxu0  ;;  %1151 = vmatpush.bf16.msrb.mxu1 %v1124_v25 }
  0xde   : > { %v584_v9 = vadd.f32 %v2387_v58, %v583_v8 }
  0xdf   : > { %v685_v35 = vpop.f32.mrf.mxu1 }
  0xe0   : > { %608 = vrot.lane.b32.xlu0 %v584_v9, %s2808_s15 }
  0xe1   : > { %1152 = vmatpush.bf16.msrb.mxu1 %v1122_v26 }
  0xe5   : > { %v585_v12 = vpop.f32.mrf.mxu0  ;;  %1509 = vmatpush.bf16.msra.mxu1 %v3033_v0 }
  0xe6   : > { %v586_v13 = vadd.f32 %v2387_v58, %v585_v12 }
  0xe7   : > { %v688_v38 = vpop.f32.mrf.mxu1 }
  0xe8   : > { %612 = vrot.lane.b32.xlu0 %v586_v13, %s2809_s16 }
  0xe9   : > { %1510 = vmatpush.bf16.msra.mxu1 %v3038_v2  ;;  %v3144_v2 = vld [vmem:[%s3820_s5 + $0x1] ss:$0 sm:$0xff] }
  0xec   : > { %2182 = vmatmul.msk.bf16.gmra.mxu3 %vm556_vm0, %v886_v11  ;;  %2193 = vmatmul.msk.bf16.gmra.mxu0 %vm556_vm0, %v965_v17 }
  0xed   : > { %v588_v14 = vpop.f32.mrf.mxu0 }
  0xee   : > { %v589_v15 = vadd.f32 %v2387_v58, %v588_v14 }
  0xef   : > { %v690_v42 = vpop.f32.mrf.mxu1 }
  0xf0   : > { %616 = vrot.lane.b32.xlu1 %v589_v15, %s2810_s23 }
  0xf5   : > { %v590_v19 = vpop.f32.mrf.mxu0 }
  0xf6   : > { %v591_v20 = vadd.f32 %v2387_v58, %v590_v19 }
  0xf7   : > { %v693_v45 = vpop.f32.mrf.mxu1 }
  0xf8   : > { %620 = vrot.lane.b32.xlu2 %v591_v20, %s2811_s10 }
  0xfc   : > { %2194 = vmatmul.msk.bf16.gmra.mxu0 %vm556_vm0, %v967_v18 }
  0xfd   : > { %v593_v23 = vpop.f32.mrf.mxu0 }
  0xfe   : > { %v594_v24 = vadd.f32 %v2387_v58, %v593_v23 }
  0xff   : > { %v695_v52 = vpop.f32.mrf.mxu1 }
 0x100   : > { %624 = vrot.lane.b32.xlu0 %v594_v24, %s2812_s3 }
 0x105   : > { %v595_v27 = vpop.f32.mrf.mxu0 }
 0x106   : > { %v596_v28 = vadd.f32 %v2387_v58, %v595_v27 }
 0x107   : > { %v698_v54 = vpop.f32.mrf.mxu1 }
 0x108   : > { %628 = vrot.lane.b32.xlu1 %v596_v28, %s2813_s13 }
 0x10f   : > { %v700_v63 = vpop.f32.mrf.mxu1 }
 0x12a   : > { %v601_v31 = vpop.permute.xlu2 %600 }
 0x12b   : > { %v684_v32 = vadd.f32 %v683_v30, %v601_v31 }
 0x12d   : > { %v3137_v33 = vadd.f32 %v3134_v29, %v684_v32 }
 0x12f   : > { %v715_v0 = vsel %vm714_vm1, %v3137_v33, -inf }
 0x130   : > { %716 = vmax.xlane.f32.xlu0 %v715_v0 }
 0x13f   : > { %v908_v34 = vpop.f32.mrf.mxu3 }
 0x140   : > { %v909_v36 = vadd.f32 %v3144_v2, %v908_v34 }
 0x142   : > { %930 = vrot.lane.b32.xlu2 %v909_v36, %s2806_s18 }
 0x147   : > { %v910_v37 = vpop.f32.mrf.mxu3 }
 0x148   : > { %v911_v39 = vadd.f32 %v3144_v2, %v910_v37 }
 0x149   : > { %v1001_v16 = vpop.f32.mrf.mxu0 }
 0x14a   : > { %934 = vrot.lane.b32.xlu0 %v911_v39, %s2807_s19  ;;  %v605_v49 = vpop.permute.xlu0 %604 }
 0x14b   : > { %v686_v53 = vadd.f32 %v685_v35, %v605_v49 }
 0x14d   : > { %v3155_v55 = vadd.f32 %v3134_v29, %v686_v53 }
 0x14f   : > { %v913_v40 = vpop.f32.mrf.mxu3  ;;  %v718_v60 = vsel %vm714_vm1, %v3155_v55, -inf }
 0x150   : > { %v914_v41 = vadd.f32 %v3144_v2, %v913_v40 }
 0x151   : > { %v1003_v18 = vpop.f32.mrf.mxu0 }
 0x152   : > { %938 = vrot.lane.b32.xlu1 %v914_v41, %s2808_s15  ;;  %v609_v50 = vpop.permute.xlu0 %608  ;;  %v621_v19 = vpop.permute.xlu2 %620 }
 0x153   : > { %v689_v58 = vadd.f32 %v688_v38, %v609_v50  ;;  %v696_v26 = vadd.f32 %v695_v52, %v621_v19 }
 0x155   : > { %v3160_v61 = vadd.f32 %v3134_v29, %v689_v58  ;;  %v3187_v32 = vadd.f32 %v3134_v29, %v696_v26 }
 0x157   : > { %v915_v43 = vpop.f32.mrf.mxu3  ;;  %v721_v7 = vsel %vm714_vm1, %v3160_v61, -inf  ;;  %v730_v39 = vsel %vm714_vm1, %v3187_v32, -inf }
 0x158   : > { %v916_v44 = vadd.f32 %v3144_v2, %v915_v43 }
 0x159   : > { %v1006_v24 = vpop.f32.mrf.mxu0 }
 0x15a   : > { %942 = vrot.lane.b32.xlu2 %v916_v44, %s2809_s16  ;;  %v613_v56 = vpop.permute.xlu0 %612 }
 0x15b   : > { %v691_v59 = vadd.f32 %v690_v42, %v613_v56 }
 0x15d   : > { %v3163_v62 = vadd.f32 %v3134_v29, %v691_v59 }
 0x15f   : > { %v724_v8 = vsel %vm714_vm1, %v3163_v62, -inf  ;;  %v918_v12 = vpop.f32.mrf.mxu3 }
 0x160   : > { %v919_v13 = vadd.f32 %v3144_v2, %v918_v12 }
 0x161   : > { %v1008_v37 = vpop.f32.mrf.mxu0 }
 0x162   : > { %v617_v57 = vpop.permute.xlu1 %616 }
 0x163   : > { %v694_v20 = vadd.f32 %v693_v45, %v617_v57 }
 0x165   : > { %v3179_v22 = vadd.f32 %v3134_v29, %v694_v20 }
 0x167   : > { %v920_v14 = vpop.f32.mrf.mxu3  ;;  %v727_v27 = vsel %vm714_vm1, %v3179_v22, -inf }
 0x168   : > { %v921_v15 = vadd.f32 %v3144_v2, %v920_v14 }
 0x16f   : > { %v923_v45 = vpop.f32.mrf.mxu3 }
 0x170   : > { %v924_v49 = vadd.f32 %v3144_v2, %v923_v45 }
 0x172   : > { %v625_v17 = vpop.permute.xlu0 %624 }
 0x173   : > { %v699_v23 = vadd.f32 %v698_v54, %v625_v17 }
 0x174   : > { %719 = vmax.xlane.f32.xlu0 %v718_v60 }
 0x175   : > { %v3184_v28 = vadd.f32 %v3134_v29, %v699_v23 }
 0x177   : > { %v733_v35 = vsel %vm714_vm1, %v3184_v28, -inf  ;;  %v925_v50 = vpop.f32.mrf.mxu3 }
 0x178   : > { %v926_v52 = vadd.f32 %v3144_v2, %v925_v50  ;;  %v1011_v2 = vpop.f32.mrf.mxu0 }
 0x17a   : > { %v629_v6 = vpop.permute.xlu1 %628 }
 0x17b   : > { %v701_v9 = vadd.f32 %v700_v63, %v629_v6 }
 0x17c   : > { %722 = vmax.xlane.f32.xlu1 %v721_v7  ;;  %725 = vmax.xlane.f32.xlu0 %v724_v8 }
 0x17d   : > { %v3170_v10 = vadd.f32 %v3134_v29, %v701_v9 }
 0x17f   : > { %v736_v11 = vsel %vm714_vm1, %v3170_v10, -inf }
 0x183   : > { %737 = vmax.xlane.f32.xlu2 %v736_v11 }
 0x190   : > { %946 = vrot.lane.b32.xlu0 %v919_v13, %s2810_s23  ;;  %v1013_v13 = vpop.f32.mrf.mxu0 }
 0x195   : > { %950 = vrot.lane.b32.xlu1 %v921_v15, %s2811_s10 }
 0x19c   : > { %v931_v25 = vpop.permute.xlu2 %930 }
 0x19d   : > { %v1002_v0 = vadd.f32 %v1001_v16, %v931_v25 }
 0x19f   : > { %v1021_v41 = vadd.f32 %v3134_v29, %v1002_v0 }
 0x1a1   : > { %v1029_v43 = vsel %vm714_vm1, %v1021_v41, -inf }
 0x1a3   : > { %v717_v21 = vpop.xlane.xlu0 %716 }
 0x1a4   : > { %v739_v59 = vsub.f32 %v3137_v33, %v717_v21 }
 0x1a6   : > { %v747_v63 = vmul.f32 1.442695, %v739_v59 }
 0x1b4   : > { %v943_v34 = vpop.permute.xlu2 %942 }
 0x1b5   : > { %v1009_v38 = vadd.f32 %v1008_v37, %v943_v34 }
 0x1b7   : > { %v3200_v42 = vadd.f32 %v3134_v29, %v1009_v38 }
 0x1b9   : > { %v1038_v44 = vsel %vm714_vm1, %v3200_v42, -inf }
 0x1ba   : > { %728 = vmax.xlane.f32.xlu0 %v727_v27 }
 0x1bc   : > { %v935_v30 = vpop.permute.xlu0 %934 }
 0x1bd   : > { %v1004_v31 = vadd.f32 %v1003_v18, %v935_v30 }
 0x1bf   : > { %734 = vmax.xlane.f32.xlu1 %v733_v35  ;;  %v3192_v36 = vadd.f32 %v3134_v29, %v1004_v31  ;;  %v1016_v35 = vpop.f32.mrf.mxu0 }
 0x1c1   : > { %v1032_v40 = vsel %vm714_vm1, %v3192_v36, -inf }
 0x1c2   : > { %731 = vmax.xlane.f32.xlu0 %v730_v39  ;;  %1033 = vmax.xlane.f32.xlu2 %v1032_v40 }
 0x1c4   : > { %v939_v60 = vpop.permute.xlu1 %938 }
 0x1c5   : > { %v1007_v12 = vadd.f32 %v1006_v24, %v939_v60 }
 0x1c7   : > { %1030 = vmax.xlane.f32.xlu1 %v1029_v43  ;;  %v3230_v18 = vadd.f32 %v3134_v29, %v1007_v12  ;;  %v1018_v50 = vpop.f32.mrf.mxu0 }
 0x1c9   : > { %v1035_v20 = vsel %vm714_vm1, %v3230_v18, -inf }
 0x1ca   : > { %1039 = vmax.xlane.f32.xlu2 %v1038_v44 }
 0x1d6   : > { %954 = vrot.lane.b32.xlu0 %v924_v49, %s2812_s3 }
 0x1de   : > { %958 = vrot.lane.b32.xlu0 %v926_v52, %s2813_s13 }
 0x1e7   : > { %v720_v53 = vpop.xlane.xlu0 %719 }
 0x1e8   : > { %v740_v54 = vsub.f32 %v3155_v55, %v720_v53 }
 0x1ea   : > { %v749_v56 = vmul.f32 1.442695, %v740_v54 }
 0x1ec   : > { %2392 = vpow2.f32 %v749_v56 }
 0x1ed   : > { %2394 = vpow2.f32 %v747_v63 }
 0x1ef   : > { %v3215_v6 = vpop.xlane.xlu0 %725  ;;  %v723_v7 = vpop.xlane.xlu1 %722 }
 0x1f2   : > { %v3210_v57 = vpop.eup %2392 }
 0x1f3   : > { %v766_v58 = vsel %vm714_vm1, %v3210_v57, 0.0  ;;  %v3217_v55 = vpop.eup %2394 }
 0x1f4   : > { %767 = vadd.xlane.f32.xlu1 %v766_v58  ;;  %v763_v33 = vsel %vm714_vm1, %v3217_v55, 0.0 }
 0x1f6   : > { %v3240_v24 = vpop.xlane.xlu2 %737 }
 0x202   : > { %v947_v8 = vpop.permute.xlu0 %946 }
 0x203   : > { %v1012_v9 = vadd.f32 %v1011_v2, %v947_v8 }
 0x205   : > { %v3220_v11 = vadd.f32 %v3134_v29, %v1012_v9 }
 0x207   : > { %v951_v14 = vpop.permute.xlu1 %950  ;;  %v1041_v15 = vsel %vm714_vm1, %v3220_v11, -inf }
 0x208   : > { %v1014_v16 = vadd.f32 %v1013_v13, %v951_v14  ;;  %764 = vadd.xlane.f32.xlu0 %v763_v33  ;;  %1042 = vmax.xlane.f32.xlu1 %v1041_v15 }
 0x20a   : > { %v3227_v17 = vadd.f32 %v3134_v29, %v1014_v16 }
 0x20c   : > { %v1044_v19 = vsel %vm714_vm1, %v3227_v17, -inf }
 0x20d   : > { %1045 = vmax.xlane.f32.xlu2 %v1044_v19  ;;  %v742_v19 = vsub.f32 %v3163_v62, %v3215_v6 }
 0x210   : > { %1036 = vmax.xlane.f32.xlu0 %v1035_v20 }
 0x22d   : > { %v3238_v23 = vpop.xlane.xlu0 %728 }
 0x232   : > { %v3236_v21 = vpop.xlane.xlu1 %734 }
 0x235   : > { %v1034_v30 = vpop.xlane.xlu2 %1033  ;;  %v3242_v31 = vpop.xlane.xlu0 %731 }
 0x236   : > { %v1054_v0 = vsub.f32 %v3192_v36, %v1034_v30  ;;  %v744_v30 = vsub.f32 %v3187_v32, %v3242_v31 }
 0x238   : > { %v1063_v38 = vmul.f32 1.442695, %v1054_v0  ;;  %v757_v6 = vmul.f32 1.442695, %v744_v30 }
 0x23a   : > { %v1031_v25 = vpop.xlane.xlu1 %1030 }
 0x23b   : > { %v1053_v26 = vsub.f32 %v1021_v41, %v1031_v25  ;;  %v741_v41 = vsub.f32 %v3160_v61, %v723_v7 }
 0x23d   : > { %v1061_v27 = vmul.f32 1.442695, %v1053_v26  ;;  %v1040_v40 = vpop.xlane.xlu2 %1039  ;;  %v751_v49 = vmul.f32 1.442695, %v741_v41  ;;  %v753_v26 = vmul.f32 1.442695, %v742_v19 }
 0x23e   : > { %v1056_v45 = vsub.f32 %v3200_v42, %v1040_v40 }
 0x23f   : > { %2396 = vpow2.f32 %v1061_v27 }
 0x240   : > { %2398 = vpow2.f32 %v1063_v38  ;;  %v1067_v52 = vmul.f32 1.442695, %v1056_v45 }
 0x241   : > { %2400 = vpow2.f32 %v751_v49 }
 0x242   : > { %2402 = vpow2.f32 %v1067_v52 }
 0x245   : > { %v3245_v34 = vpop.eup %2396 }
 0x246   : > { %v1077_v37 = vsel %vm714_vm1, %v3245_v34, 0.0  ;;  %v3256_v56 = vpop.eup %2398 }
 0x247   : > { %1078 = vadd.xlane.f32.xlu1 %v1077_v37  ;;  %v1080_v58 = vsel %vm714_vm1, %v3256_v56, 0.0  ;;  %v3265_v59 = vpop.eup %2400 }
 0x248   : > { %v955_v39 = vpop.permute.xlu0 %954  ;;  %v3267_v60 = vpop.eup %2402  ;;  %v769_v2 = vsel %vm714_vm1, %v3265_v59, 0.0 }
 0x249   : > { %v1017_v43 = vadd.f32 %v1016_v35, %v955_v39  ;;  %v1086_v63 = vsel %vm714_vm1, %v3267_v60, 0.0 }
 0x24b   : > { %v3251_v44 = vadd.f32 %v3134_v29, %v1017_v43 }
 0x24d   : > { %v1047_v36 = vsel %vm714_vm1, %v3251_v44, -inf }
 0x24e   : > { %1048 = vmax.xlane.f32.xlu2 %v1047_v36 }
 0x250   : > { %v959_v53 = vpop.permute.xlu0 %958 }
 0x251   : > { %v1019_v54 = vadd.f32 %v1018_v50, %v959_v53 }
 0x253   : > { %v3259_v61 = vadd.f32 %v3134_v29, %v1019_v54 }
 0x255   : > { %v1050_v42 = vsel %vm714_vm1, %v3259_v61, -inf }
 0x256   : > { %1081 = vadd.xlane.f32.xlu2 %v1080_v58  ;;  %1051 = vmax.xlane.f32.xlu0 %v1050_v42 }
 0x25e   : > { %1087 = vadd.xlane.f32.xlu2 %v1086_v63  ;;  %770 = vadd.xlane.f32.xlu0 %v769_v2 }
 0x267   : > { %v768_v7 = vpop.xlane.xlu1 %767 }
 0x268   : > { %2404 = vrcp.f32 %v768_v7 }
 0x26e   : > { %v2405_v9 = vpop.eup %2404 }
 0x26f   : > { %v796_v33 = vmul.f32 %v2405_v9, %v3210_v57  ;;  %v743_v57 = vsub.f32 %v3179_v22, %v3238_v23 }
 0x271   : > { %v755_v35 = vmul.f32 1.442695, %v743_v57 }
 0x272   : > { %1183 = vrot.lane.b32.xlu0 %v3051_v4, %s2814_s29 }
 0x276   : > { %1181 = vrot.lane.b32.xlu2 %v3036_v1, %s2814_s29 }
 0x27b   : > { %v765_v8 = vpop.xlane.xlu0 %764  ;;  %v1043_v25 = vpop.xlane.xlu1 %1042 }
 0x27c   : > { %2406 = vrcp.f32 %v765_v8  ;;  %v1057_v27 = vsub.f32 %v3220_v11, %v1043_v25 }
 0x280   : > { %v1046_v0 = vpop.xlane.xlu2 %1045 }
 0x281   : > { %v1058_v11 = vsub.f32 %v3227_v17, %v1046_v0 }
 0x282   : > { %v2407_v12 = vpop.eup %2406 }
 0x283   : > { %v1037_v13 = vpop.xlane.xlu0 %1036  ;;  %v795_v14 = vmul.f32 %v2407_v12, %v3217_v55  ;;  %v1071_v32 = vmul.f32 1.442695, %v1058_v11 }
 0x284   : > { %v1055_v15 = vsub.f32 %v3230_v18, %v1037_v13  ;;  %v1069_v18 = vmul.f32 1.442695, %v1057_v27 }
 0x285   : > { %v803_v16 = vpack.c.bf16 %v796_v33, %v795_v14 }
 0x286   : > { %v1065_v20 = vmul.f32 1.442695, %v1055_v15 }
 0x287   : > { %2171 = vmatmul.msk.bf16.vlgmr.msra.gmra.mxu2 %vm714_vm1, %v803_v16 }
 0x288   : > { %2408 = vpow2.f32 %v1065_v20 }
 0x289   : > { %2410 = vpow2.f32 %v753_v26 }
 0x28a   : > { %2412 = vpow2.f32 %v1069_v18 }
 0x28b   : > { %2414 = vpow2.f32 %v757_v6 }
 0x28c   : > { %2416 = vpow2.f32 %v755_v35 }
 0x28d   : > { %2418 = vpow2.f32 %v1071_v32 }
 0x28e   : > { %v3286_v55 = vpop.eup %2408 }
 0x28f   : > { %v1083_v62 = vsel %vm714_vm1, %v3286_v55, 0.0  ;;  %v3293_v37 = vpop.eup %2410 }
 0x290   : > { %1084 = vadd.xlane.f32.xlu1 %v1083_v62  ;;  %v772_v31 = vsel %vm714_vm1, %v3293_v37, 0.0  ;;  %v3297_v22 = vpop.eup %2412 }
 0x291   : > { %v3299_v23 = vpop.eup %2414  ;;  %v1089_v38 = vsel %vm714_vm1, %v3297_v22, 0.0 }
 0x292   : > { %v3303_v39 = vpop.eup %2416  ;;  %v778_v17 = vsel %vm714_vm1, %v3299_v23, 0.0 }
 0x293   : > { %v775_v40 = vsel %vm714_vm1, %v3303_v39, 0.0  ;;  %v3309_v43 = vpop.eup %2418 }
 0x294   : > { %v1092_v41 = vsel %vm714_vm1, %v3309_v43, 0.0 }
 0x298   : > { %773 = vadd.xlane.f32.xlu1 %v772_v31  ;;  %v2270_v31 = vld [vmem:[%s3015_s8 + $0x28] sm:$0xff] }
 0x299   : > { %1300 = vmatpush.bf16.msrb.mxu2 %v2270_v31 }
 0x29c   : > { %1090 = vadd.xlane.f32.xlu0 %v1089_v38  ;;  %v2269_v38 = vld [vmem:[%s3015_s8 + $0x20] sm:$0xff] }
 0x29d   : > { %1301 = vmatpush.bf16.msrb.mxu2 %v2269_v38 }
 0x29f   : > { %779 = vadd.xlane.f32.xlu2 %v778_v17 }
 0x2a0   : > { %776 = vadd.xlane.f32.xlu1 %v775_v40 }
 0x2a4   : > { %1093 = vadd.xlane.f32.xlu0 %v1092_v41 }
 0x2b7   : > { %1485 = vrot.lane.b32.xlu2 %v3051_v4, %s2815_s22 }
 0x2b8   : > { %1185 = vrot.lane.b32.xlu0 %v3041_v3, %s2814_s29 }
 0x2b9   : > { %1483 = vrot.lane.b32.xlu1 %v3036_v1, %s2815_s22  ;;  %v746_v1 = vsub.f32 %v3170_v10, %v3240_v24 }
 0x2ba   : > { %v1079_v36 = vpop.xlane.xlu1 %1078 }
 0x2bb   : > { %2420 = vrcp.f32 %v1079_v36  ;;  %v761_v63 = vmul.f32 1.442695, %v746_v1 }
 0x2bf   : > { %1487 = vrot.lane.b32.xlu2 %v3041_v3, %s2815_s22 }
 0x2c1   : > { %v1049_v45 = vpop.xlane.xlu2 %1048  ;;  %v2421_v50 = vpop.eup %2420 }
 0x2c2   : > { %v1059_v52 = vsub.f32 %v3251_v44, %v1049_v45  ;;  %v1109_v3 = vmul.f32 %v2421_v50, %v3245_v34  ;;  %v745_v44 = vsub.f32 %v3184_v28, %v3236_v21 }
 0x2c4   : > { %v1073_v42 = vmul.f32 1.442695, %v1059_v52  ;;  %v759_v24 = vmul.f32 1.442695, %v745_v44 }
 0x2c7   : > { %1564 = vrot.lane.b32.xlu2 %v3073_v46, %s2815_s22 }
 0x2c9   : > { %v1082_v49 = vpop.xlane.xlu2 %1081  ;;  %v3331_v2 = vpop.xlane.xlu0 %1051 }
 0x2ca   : > { %2422 = vrcp.f32 %v1082_v49 }
 0x2cb   : > { %2424 = vpow2.f32 %v1073_v42 }
 0x2cc   : > { %2426 = vpow2.f32 %v761_v63 }
 0x2cd   : > { %2428 = vpow2.f32 %v759_v24 }
 0x2cf   : > { %1489 = vrot.lane.b32.xlu2 %v3058_v5, %s2815_s22 }
 0x2d0   : > { %v2423_v4 = vpop.eup %2422 }
 0x2d1   : > { %v1110_v53 = vmul.f32 %v2423_v4, %v3256_v56  ;;  %v1088_v54 = vpop.xlane.xlu2 %1087  ;;  %v3338_v34 = vpop.eup %2424 }
 0x2d2   : > { %v3340_v56 = vpop.eup %2426  ;;  %v771_v7 = vpop.xlane.xlu0 %770  ;;  %v1095_v8 = vsel %vm714_vm1, %v3338_v34, 0.0  ;;  %2430 = vrcp.f32 %v1088_v54 }
 0x2d3   : > { %v1117_v58 = vpack.c.bf16 %v1110_v53, %v1109_v3  ;;  %v784_v28 = vsel %vm714_vm1, %v3340_v56, 0.0  ;;  %v3348_v21 = vpop.eup %2428 }
 0x2d4   : > { %v781_v12 = vsel %vm714_vm1, %v3348_v21, 0.0 }
 0x2d5   : > { %2195 = vmatmul.msk.bf16.vlgmr.msrb.gmra.mxu1 %vm714_vm1, %v1117_v58 }
 0x2d7   : > { %1264 = vrot.lane.b32.xlu2 %v3077_v48, %s2814_s29 }
 0x2d8   : > { %v2431_v14 = vpop.eup %2430 }
 0x2d9   : > { %v1182_v10 = vpop.permute.xlu2 %1181 }
 0x2da   : > { %2203 = vmatmul.msk.bf16.vlgmr.msrb.gmra.mxu3 %vm556_vm0, %v1182_v10 }
 0x2df   : > { %1266 = vrot.lane.b32.xlu2 %v3075_v47, %s2814_s29 }
 0x2e2   : > { %1096 = vadd.xlane.f32.xlu0 %v1095_v8 }
 0x2e3   : > { %785 = vadd.xlane.f32.xlu1 %v784_v28 }
 0x2e4   : > { %v1184_v9 = vpop.permute.xlu0 %1183 }
 0x2ea   : > { %782 = vadd.xlane.f32.xlu0 %v781_v12  ;;  %2204 = vmatmul.msk.bf16.gmra.mxu3 %vm556_vm0, %v1184_v9  ;;  %v2272_v9 = vld [vmem:[%s3015_s8 + $0x38] sm:$0xff]  ;;  %v2271_v12 = vld [vmem:[%s3015_s8 + $0x30] sm:$0xff] }
 0x2eb   : > { %1602 = vmatpush.bf16.msra.mxu3 %v2272_v9 }
 0x2ef   : > { %1603 = vmatpush.bf16.msra.mxu3 %v2271_v12 }
 0x2fc   : > { %1262 = vrot.lane.b32.xlu1 %v3073_v46, %s2814_s29  ;;  %v1112_v46 = vmul.f32 %v2431_v14, %v3267_v60 }
 0x2fe   : > { %1187 = vrot.lane.b32.xlu0 %v3058_v5, %s2814_s29 }
 0x303   : > { %v1085_v13 = vpop.xlane.xlu1 %1084 }
 0x304   : > { %2432 = vrcp.f32 %v1085_v13  ;;  %1570 = vrot.lane.b32.xlu1 %v3089_v51, %s2815_s22 }
 0x305   : > { %2434 = vrcp.f32 %v771_v7 }
 0x306   : > { %1566 = vrot.lane.b32.xlu0 %v3077_v48, %s2815_s22 }
 0x30a   : > { %v2433_v33 = vpop.eup %2432 }
 0x30b   : > { %v774_v15 = vpop.xlane.xlu1 %773  ;;  %v1111_v16 = vmul.f32 %v2433_v33, %v3286_v55  ;;  %v2435_v20 = vpop.eup %2434 }
 0x30c   : > { %2436 = vrcp.f32 %v774_v15  ;;  %v797_v48 = vmul.f32 %v2435_v20, %v3265_v59  ;;  %v3416_v33 = vpop.f32.mrf.mxu2 }
 0x30d   : > { %v1118_v19 = vpack.c.bf16 %v1112_v46, %v1111_v16 }
 0x30e   : > { %1568 = vrot.lane.b32.xlu0 %v3075_v47, %s2815_s22 }
 0x30f   : > { %2196 = vmatmul.msk.bf16.gmra.mxu1 %vm714_vm1, %v1118_v19  ;;  %v1091_v5 = vpop.xlane.xlu0 %1090 }
 0x310   : > { %2438 = vrcp.f32 %v1091_v5  ;;  %v1060_v5 = vsub.f32 %v3259_v61, %v3331_v2 }
 0x312   : > { %v2437_v25 = vpop.eup %2436  ;;  %v780_v26 = vpop.xlane.xlu2 %779  ;;  %v1075_v20 = vmul.f32 1.442695, %v1060_v5 }
 0x313   : > { %v798_v27 = vmul.f32 %v2437_v25, %v3293_v37  ;;  %v777_v30 = vpop.xlane.xlu1 %776  ;;  %2440 = vrcp.f32 %v780_v26 }
 0x314   : > { %2442 = vrcp.f32 %v777_v30  ;;  %v3420_v46 = vpop.f32.mrf.mxu2 }
 0x315   : > { %v804_v55 = vpack.c.bf16 %v798_v27, %v797_v48 }
 0x316   : > { %1268 = vrot.lane.b32.xlu0 %v3089_v51, %s2814_s29  ;;  %v2439_v60 = vpop.eup %2438 }
 0x317   : > { %2172 = vmatmul.msk.bf16.gmra.mxu2 %vm714_vm1, %v804_v55  ;;  %v1094_v47 = vpop.xlane.xlu0 %1093  ;;  %v1113_v0 = vmul.f32 %v2439_v60, %v3297_v22 }
 0x318   : > { %2444 = vrcp.f32 %v1094_v47 }
 0x319   : > { %v2441_v57 = vpop.eup %2440 }
 0x31a   : > { %v2443_v18 = vpop.eup %2442  ;;  %v800_v51 = vmul.f32 %v2441_v57, %v3299_v23  ;;  %v3387_v23 = vld [vmem:[%s3820_s5 + $0x2] ss:$0 sm:$0xff]  ;;  %v3390_v41 = vpop.permute.xlu2 %1485 }
 0x31b   : > { %v799_v35 = vmul.f32 %v2443_v18, %v3303_v39 }
 0x31d   : > { %v805_v11 = vpack.c.bf16 %v800_v51, %v799_v35 }
 0x31e   : > { %v2445_v59 = vpop.eup %2444 }
 0x31f   : > { %v1114_v62 = vmul.f32 %v2445_v59, %v3309_v43 }
 0x321   : > { %v1119_v6 = vpack.c.bf16 %v1114_v62, %v1113_v0 }
 0x322   : > { %v3397_v3 = vpop.permute.xlu2 %1487 }
 0x323   : > { %2197 = vmatmul.msk.bf16.gmra.mxu1 %vm714_vm1, %v1119_v6 }
 0x327   : > { %2173 = vmatmul.msk.bf16.gmra.mxu2 %vm714_vm1, %v805_v11 }
 0x32a   : > { %v1186_v37 = vpop.permute.xlu0 %1185  ;;  %v1565_v42 = vpop.permute.xlu2 %1564 }
 0x32b   : > { %2205 = vmatmul.msk.bf16.gmra.mxu3 %vm556_vm0, %v1186_v37  ;;  %v3378_v32 = vpop.permute.xlu1 %1483 }
 0x332   : > { %v3406_v24 = vpop.permute.xlu2 %1489 }
 0x355   : > { %v3381_v22 = vpop.xlane.xlu0 %1096 }
 0x356   : > { %v786_v17 = vpop.xlane.xlu1 %785 }
 0x357   : > { %2446 = vrcp.f32 %v786_v17 }
 0x35d   : > { %v1210_v39 = vpop.f32.mrf.mxu3  ;;  %v783_v40 = vpop.xlane.xlu0 %782 }
 0x35e   : > { %v1211_v43 = vadd.f32 %v3387_v23, %v1210_v39  ;;  %2448 = vrcp.f32 %v783_v40  ;;  %v2447_v45 = vpop.eup %2446 }
 0x35f   : > { %v802_v4 = vmul.f32 %v2447_v45, %v3340_v56  ;;  %v1265_v56 = vpop.permute.xlu2 %1264  ;;  %2450 = vpow2.f32 %v1075_v20 }
 0x360   : > { %1232 = vrot.lane.b32.xlu0 %v1211_v43, %s2806_s18  ;;  %2452 = vrcp.f32 %v3381_v22 }
 0x364   : > { %v2449_v36 = vpop.eup %2448 }
 0x365   : > { %v1212_v49 = vpop.f32.mrf.mxu3  ;;  %v801_v50 = vmul.f32 %v2449_v36, %v3348_v21  ;;  %v2451_v26 = vpop.eup %2450 }
 0x366   : > { %v1213_v52 = vadd.f32 %v3387_v23, %v1212_v49  ;;  %v1098_v27 = vsel %vm714_vm1, %v2451_v26, 0.0 }
 0x367   : > { %v806_v1 = vpack.c.bf16 %v802_v4, %v801_v50  ;;  %v1267_v7 = vpop.permute.xlu2 %1266 }
 0x368   : > { %1236 = vrot.lane.b32.xlu2 %v1213_v52, %s2807_s19 }
 0x369   : > { %2174 = vmatmul.msk.bf16.gmra.mxu2 %vm714_vm1, %v806_v1 }
 0x36d   : > { %v1215_v53 = vpop.f32.mrf.mxu3 }
 0x36e   : > { %v1216_v54 = vadd.f32 %v3387_v23, %v1215_v53  ;;  %v1263_v10 = vpop.permute.xlu1 %1262 }
 0x370   : > { %1240 = vrot.lane.b32.xlu2 %v1216_v54, %s2808_s15  ;;  %v1188_v58 = vpop.permute.xlu0 %1187 }
 0x371   : > { %2206 = vmatmul.msk.bf16.gmra.mxu3 %vm556_vm0, %v1188_v58 }
 0x375   : > { %v1217_v63 = vpop.f32.mrf.mxu3 }
 0x376   : > { %v1218_v44 = vadd.f32 %v3387_v23, %v1217_v63  ;;  %v1571_v30 = vpop.permute.xlu1 %1570 }
 0x378   : > { %1244 = vrot.lane.b32.xlu1 %v1218_v44, %s2809_s16  ;;  %v1567_v8 = vpop.permute.xlu0 %1566 }
 0x379   : > { %2215 = vmatmul.msk.bf16.vlgmr.msrb.gmra.mxu2 %vm556_vm0, %v1263_v10 }
 0x380   : > { %v1569_v28 = vpop.permute.xlu0 %1568 }
 0x381   : > { %2239 = vmatmul.msk.bf16.vlgmr.msra.gmra.mxu3 %vm556_vm0, %v1565_v42 }
 0x388   : > { %v1269_v21 = vpop.permute.xlu0 %1268 }
 0x389   : > { %2216 = vmatmul.msk.bf16.gmra.mxu2 %vm556_vm0, %v1265_v56 }
 0x391   : > { %2240 = vmatmul.msk.bf16.gmra.mxu3 %vm556_vm0, %v1567_v8 }
 0x399   : > { %2217 = vmatmul.msk.bf16.gmra.mxu2 %vm556_vm0, %v1267_v7  ;;  %v2453_v7 = vpop.eup %2452 }
 0x39a   : > { %v3423_v19 = vpop.f32.mrf.mxu2 }
 0x3a1   : > { %2241 = vmatmul.msk.bf16.gmra.mxu3 %vm556_vm0, %v1569_v28  ;;  %v1115_v28 = vmul.f32 %v2453_v7, %v3338_v34 }
 0x3a2   : > { %v3427_v25 = vpop.f32.mrf.mxu2 }
 0x3a9   : > { %2218 = vmatmul.msk.bf16.gmra.mxu2 %vm556_vm0, %v1269_v21 }
 0x3aa   : > { %v3430_v48 = vpop.f32.mrf.mxu2 }
 0x3ae   : > { %v1220_v13 = vpop.f32.mrf.mxu3 }
 0x3af   : > { %v1221_v14 = vadd.f32 %v3387_v23, %v1220_v13 }
 0x3b1   : > { %1248 = vrot.lane.b32.xlu1 %v1221_v14, %s2810_s23  ;;  %2242 = vmatmul.msk.bf16.gmra.mxu3 %vm556_vm0, %v1571_v30 }
 0x3b2   : > { %v3434_v55 = vpop.f32.mrf.mxu2 }
 0x3b6   : > { %v1222_v15 = vpop.f32.mrf.mxu3 }
 0x3b7   : > { %v1223_v16 = vadd.f32 %v3387_v23, %v1222_v15 }
 0x3b9   : > { %1252 = vrot.lane.b32.xlu0 %v1223_v16, %s2811_s10 }
 0x3c2   : > { %v1237_v37 = vpop.permute.xlu2 %1236 }
 0x3ca   : > { %v1241_v39 = vpop.permute.xlu2 %1240 }
 0x3d2   : > { %v1233_v57 = vpop.permute.xlu0 %1232 }
 0x3db   : > { %1099 = vadd.xlane.f32.xlu1 %v1098_v27  ;;  %v3491_v27 = vld [vmem:[%s3021_s11 + $0x10] sm:$0xff] }
 0x3ea   : > { %v1245_v31 = vpop.permute.xlu1 %1244 }
 0x3ec   : > { %v3436_v47 = vpop.f32.mrf.mxu2 }
 0x3f4   : > { %v3438_v61 = vpop.f32.mrf.mxu2  ;;  %v1225_v2 = vpop.f32.mrf.mxu3 }
 0x3f5   : > { %v1226_v60 = vadd.f32 %v3387_v23, %v1225_v2 }
 0x3f7   : > { %1256 = vrot.lane.b32.xlu1 %v1226_v60, %s2812_s3 }
 0x3fc   : > { %v1227_v18 = vpop.f32.mrf.mxu3  ;;  %v1303_v59 = vpop.f32.mrf.mxu2 }
 0x3fd   : > { %v1228_v0 = vadd.f32 %v3387_v23, %v1227_v18  ;;  %v1304_v62 = vadd.f32 %v1303_v59, %v1233_v57 }
 0x3ff   : > { %1260 = vrot.lane.b32.xlu2 %v1228_v0, %s2813_s13  ;;  %v3445_v6 = vadd.f32 %v3134_v29, %v1304_v62 }
 0x401   : > { %v1331_v35 = vsel %vm714_vm1, %v3445_v6, -inf }
 0x402   : > { %1332 = vmax.xlane.f32.xlu0 %v1331_v35 }
 0x404   : > { %v1305_v51 = vpop.f32.mrf.mxu2  ;;  %v1605_v7 = vpop.f32.mrf.mxu3 }
 0x405   : > { %v1306_v43 = vadd.f32 %v1305_v51, %v1237_v37 }
 0x407   : > { %v3457_v50 = vadd.f32 %v3134_v29, %v1306_v43 }
 0x409   : > { %v1334_v1 = vsel %vm714_vm1, %v3457_v50, -inf }
 0x40c   : > { %v1308_v11 = vpop.f32.mrf.mxu2 }
 0x40d   : > { %v1309_v40 = vadd.f32 %v1308_v11, %v1241_v39 }
 0x40f   : > { %v3452_v23 = vadd.f32 %v3134_v29, %v1309_v40 }
 0x411   : > { %v1337_v36 = vsel %vm714_vm1, %v3452_v23, -inf }
 0x414   : > { %v1310_v38 = vpop.f32.mrf.mxu2 }
 0x415   : > { %v3449_v17 = vadd.f32 %v1310_v38, %v1245_v31 }
 0x417   : > { %v3525_v40 = vadd.f32 %v3134_v29, %v3449_v17 }
 0x41c   : > { %v1313_v45 = vpop.f32.mrf.mxu2 }
 0x421   : > { %1338 = vmax.xlane.f32.xlu1 %v1337_v36 }
 0x423   : > { %v1249_v49 = vpop.permute.xlu1 %1248 }
 0x424   : > { %v1314_v4 = vadd.f32 %v1313_v45, %v1249_v49  ;;  %v1315_v54 = vpop.f32.mrf.mxu2  ;;  %v1340_v45 = vsel %vm714_vm1, %v3525_v40, -inf }
 0x426   : > { %v3460_v52 = vadd.f32 %v3134_v29, %v1314_v4 }
 0x428   : > { %1335 = vmax.xlane.f32.xlu2 %v1334_v1  ;;  %v1343_v53 = vsel %vm714_vm1, %v3460_v52, -inf }
 0x429   : > { %1344 = vmax.xlane.f32.xlu0 %v1343_v53 }
 0x42b   : > { %v1253_v58 = vpop.permute.xlu0 %1252 }
 0x42c   : > { %v1316_v42 = vadd.f32 %v1315_v54, %v1253_v58  ;;  %v1318_v10 = vpop.f32.mrf.mxu2 }
 0x42e   : > { %v3467_v63 = vadd.f32 %v3134_v29, %v1316_v42 }
 0x430   : > { %v1346_v44 = vsel %vm714_vm1, %v3467_v63, -inf }
 0x431   : > { %1347 = vmax.xlane.f32.xlu0 %v1346_v44 }
 0x434   : > { %v1320_v9 = vpop.f32.mrf.mxu2 }
 0x44e   : > { %v1100_v56 = vpop.xlane.xlu1 %1099 }
 0x44f   : > { %2454 = vrcp.f32 %v1100_v56 }
 0x455   : > { %v2455_v8 = vpop.eup %2454 }
 0x456   : > { %v1116_v21 = vmul.f32 %v2455_v8, %v2451_v26  ;;  %v2520_v26 = vld [vmem:[%s3021_s11 + $0x18] sm:$0xff] }
 0x458   : > { %v1120_v12 = vpack.c.bf16 %v1116_v21, %v1115_v28 }
 0x459   : > { %v1261_v13 = vpop.permute.xlu2 %1260 }
 0x45a   : > { %v1321_v14 = vadd.f32 %v1320_v9, %v1261_v13  ;;  %2198 = vmatmul.msk.bf16.gmra.mxu1 %vm714_vm1, %v1120_v12 }
 0x45c   : > { %v3475_v15 = vadd.f32 %v3134_v29, %v1321_v14  ;;  %v1607_v14 = vpop.f32.mrf.mxu3 }
 0x45e   : > { %v1352_v22 = vsel %vm714_vm1, %v3475_v15, -inf }
 0x45f   : > { %1353 = vmax.xlane.f32.xlu1 %v1352_v22 }
 0x469   : > { %v1257_v16 = vpop.permute.xlu1 %1256 }
 0x46a   : > { %v1319_v5 = vadd.f32 %v1318_v10, %v1257_v16  ;;  %2227 = vmatmul.msk.bf16.vlgmr.msra.gmra.mxu1 %vm556_vm0, %v3378_v32  ;;  %v3499_v32 = vpop.f32.mrf.mxu1 }
 0x46c   : > { %v3482_v34 = vadd.f32 %v3134_v29, %v1319_v5 }
 0x46e   : > { %v1349_v20 = vsel %vm714_vm1, %v3482_v34, -inf }
 0x46f   : > { %1350 = vmax.xlane.f32.xlu0 %v1349_v20 }
 0x472   : > { %v3501_v30 = vpop.f32.mrf.mxu1 }
 0x475   : > { %v1333_v42 = vpop.xlane.xlu0 %1332 }
 0x476   : > { %v1355_v8 = vsub.f32 %v3445_v6, %v1333_v42 }
 0x478   : > { %1429 = vrot.lane.b32.xlu1 %v2520_v26, %s2814_s29  ;;  %v1363_v21 = vmul.f32 1.442695, %v1355_v8  ;;  %v3585_v8 = vld [vmem:[%s3021_s11] sm:$0xff] }
 0x47a   : > { %2228 = vmatmul.msk.bf16.gmra.mxu1 %vm556_vm0, %v3390_v41  ;;  %v3503_v2 = vpop.f32.mrf.mxu1  ;;  %2456 = vpow2.f32 %v1363_v21 }
 0x480   : > { %v3547_v22 = vpop.eup %2456 }
 0x481   : > { %v1379_v6 = vsel %vm714_vm1, %v3547_v22, 0.0 }
 0x482   : > { %v3505_v60 = vpop.f32.mrf.mxu1 }
 0x483   : > { %1729 = vrot.lane.b32.xlu0 %v3491_v27, %s2815_s22 }
 0x48a   : > { %2229 = vmatmul.msk.bf16.gmra.mxu1 %vm556_vm0, %v3397_v3  ;;  %v3507_v41 = vpop.f32.mrf.mxu1  ;;  %v2391_v3 = vld [vmem:[%s3820_s5 + $0x3] ss:$0 sm:$0xff] }
 0x492   : > { %v3509_v57 = vpop.f32.mrf.mxu1 }
 0x494   : > { %v3532_v53 = vpop.xlane.xlu1 %1338 }
 0x49a   : > { %2230 = vmatmul.msk.bf16.gmra.mxu1 %vm556_vm0, %v3406_v24 }
 0x49b   : > { %v1336_v44 = vpop.xlane.xlu2 %1335 }
 0x49c   : > { %v3537_v10 = vpop.xlane.xlu0 %1344 }
 0x4a4   : > { %v3543_v12 = vpop.xlane.xlu0 %1347 }
 0x4d2   : > { %v3535_v17 = vpop.xlane.xlu1 %1353 }
 0x4d7   : > { %v3511_v18 = vpop.f32.mrf.mxu1 }
 0x4df   : > { %v3513_v59 = vpop.f32.mrf.mxu1 }
 0x4e2   : > { %v3549_v16 = vpop.xlane.xlu0 %1350 }
 0x4e7   : > { %v1512_v24 = vpop.f32.mrf.mxu1 }
 0x4e8   : > { %v1513_v0 = vadd.f32 %v2391_v3, %v1512_v24 }
 0x4ea   : > { %1534 = vrot.lane.b32.xlu2 %v1513_v0, %s2806_s18  ;;  %v1430_v58 = vpop.permute.xlu1 %1429 }
 0x4eb   : > { %1451 = vmatpush.bf16.msra.mxu0 %v1430_v58 }
 0x4ef   : > { %v1514_v62 = vpop.f32.mrf.mxu1 }
 0x4f0   : > { %v1515_v35 = vadd.f32 %v2391_v3, %v1514_v62 }
 0x4f2   : > { %1538 = vrot.lane.b32.xlu1 %v1515_v35, %s2807_s19  ;;  %s1908_s19 = scalar_lea.sflag [#allocation4], %s3001_s20 }
 0x4f5   : > { %v1730_v0 = vpop.permute.xlu0 %1729 }
 0x4f7   : > { %v1517_v51 = vpop.f32.mrf.mxu1 }
 0x4f8   : > { %v1518_v11 = vadd.f32 %v2391_v3, %v1517_v51 }
 0x4fa   : > { %1542 = vrot.lane.b32.xlu1 %v1518_v11, %s2808_s15 }
 0x4ff   : > { %v1519_v37 = vpop.f32.mrf.mxu1 }
 0x500   : > { %v1520_v31 = vadd.f32 %v2391_v3, %v1519_v37 }
 0x502   : > { %1546 = vrot.lane.b32.xlu0 %v1520_v31, %s2809_s16 }
 0x507   : > { %v1522_v38 = vpop.f32.mrf.mxu1 }
 0x508   : > { %v1523_v39 = vadd.f32 %v2391_v3, %v1522_v38 }
 0x50a   : > { %1550 = vrot.lane.b32.xlu0 %v1523_v39, %s2810_s23 }
 0x50f   : > { %v1524_v43 = vpop.f32.mrf.mxu1 }
 0x510   : > { %v1525_v54 = vadd.f32 %v2391_v3, %v1524_v43 }
 0x513   : > { %1341 = vmax.xlane.f32.xlu2 %v1340_v45 }
 0x517   : > { %v1527_v36 = vpop.f32.mrf.mxu1 }
 0x518   : > { %v1528_v49 = vadd.f32 %v2391_v3, %v1527_v36  ;;  %v2523_v36 = vld [vmem:[%s3021_s11 + $0x8] sm:$0xff]  ;;  %s3738_s11 = scalar_lea.vmem [#allocation13], %s2110_s1  ;;  %s2273_s1 = sshll.u32 %s2791_s27, 6 }
 0x519   : > { %s1921_s27 = scalar_lea.hbm %s3822_s7, %s2273_s1  ;;  %s1922_s17 = sshll.u32 %s3738_s11, 4  ;;  %s1923_s17 = int_to_ptr.vmem [resolvable:$true] %s1922_s17 }
 0x51a   : > { %1558 = vrot.lane.b32.xlu0 %v1528_v49, %s2812_s3  ;;  %s1924_s18 = sshll.u32 %s1921_s27, 4  ;;  %s2725_s3 = scalar_lea.hbm %s3822_s7, 128  ;;  %s1925_s18 = int_to_ptr.hbm [resolvable:$true] %s1924_s18 }
 0x51b   : > { %s2719_s15 = sshra.s32 %s1925_s18, 4  ;;  %s2720_s15 = int_to_ptr.hbm [resolvable:$true] %s2719_s15 }
 0x51c   : > { %s2721_s16 = scalar_lea.hbm %s2720_s15, 64  ;;  %p2726_p8 = scmp.lt.s32.totalorder %s2720_s15, %s3822_s7 }
 0x51d   : > { %p2722_p1 = scmp.ne.s32.totalorder %s2720_s15, %s2721_s16  ;;  %p2727_p10 = scmp.lt.s32.totalorder %s2725_s3, %s2721_s16 }
 0x51f   : > { %v1529_v4 = vpop.f32.mrf.mxu1  ;;  %p2723_p2 = pnand %p2722_p1, %p2938_p5  ;;  %p2728_p11 = por %p2727_p10, %p2726_p8 }
 0x520   : > { %v1530_v1 = vadd.f32 %v2391_v3, %v1529_v4  ;;  %v1610_v3 = vpop.f32.mrf.mxu3 }
 0x521   : > { %p2724_p4 = pneg %p2723_p2 }
 0x522   : > { %1562 = vrot.lane.b32.xlu0 %v1530_v1, %s2813_s13 }
 0x523   : > { %p2729_p12 = pnand %p2728_p11, %p2724_p4 }
 0x528   : > { %v1612_v37 = vpop.f32.mrf.mxu3 }
 0x52b   : > { %1731 = vrot.lane.b32.xlu2 %v2520_v26, %s2815_s22 }
 0x530   : > { %v1615_v45 = vpop.f32.mrf.mxu3 }
 0x533   : > { %1554 = vrot.lane.b32.xlu2 %v1525_v54, %s2811_s10 }
 0x544   : > { %v1535_v56 = vpop.permute.xlu2 %1534 }
 0x545   : > { %v1606_v28 = vadd.f32 %v1605_v7, %v1535_v56  ;;  %v1356_v56 = vsub.f32 %v3457_v50, %v1336_v44  ;;  %v1362_v50 = vsub.f32 %v3475_v15, %v3535_v17 }
 0x547   : > { %v3541_v9 = vadd.f32 %v3134_v29, %v1606_v28  ;;  %v3555_v29 = vld [vmem:[%s418_s26] ss:$0 sm:$0xff]  ;;  %v1617_v28 = vpop.f32.mrf.mxu3  ;;  %v1365_v21 = vmul.f32 1.442695, %v1356_v56 }
 0x549   : > { %v1633_v13 = vsel %vm714_vm1, %v3541_v9, -inf  ;;  %2458 = vpow2.f32 %v1365_v21 }
 0x54f   : > { %v3596_v44 = vpop.eup %2458 }
 0x55c   : > { %1634 = vmax.xlane.f32.xlu2 %v1633_v13 }
 0x564   : > { %v1539_v5 = vpop.permute.xlu1 %1538  ;;  %1380 = vadd.xlane.f32.xlu2 %v1379_v6 }
 0x565   : > { %v1608_v20 = vadd.f32 %v1607_v14, %v1539_v5 }
 0x567   : > { %v3558_v26 = vadd.f32 %v3555_v29, %v1608_v20 }
 0x569   : > { %v1636_v24 = vsel %vm714_vm1, %v3558_v26, -inf }
 0x56a   : > { %1637 = vmax.xlane.f32.xlu1 %v1636_v24  ;;  %v1620_v24 = vpop.f32.mrf.mxu3 }
 0x56c   : > { %v1543_v62 = vpop.permute.xlu1 %1542 }
 0x56d   : > { %v1611_v35 = vadd.f32 %v1610_v3, %v1543_v62  ;;  %v1382_v62 = vsel %vm714_vm1, %v3596_v44, 0.0 }
 0x56f   : > { %v3563_v51 = vadd.f32 %v3555_v29, %v1611_v35 }
 0x571   : > { %v1639_v11 = vsel %vm714_vm1, %v3563_v51, -inf }
 0x572   : > { %1640 = vmax.xlane.f32.xlu0 %v1639_v11 }
 0x574   : > { %v1547_v31 = vpop.permute.xlu0 %1546 }
 0x575   : > { %v1613_v38 = vadd.f32 %v1612_v37, %v1547_v31 }
 0x577   : > { %v3568_v39 = vadd.f32 %v3555_v29, %v1613_v38  ;;  %v1622_v38 = vpop.f32.mrf.mxu3 }
 0x579   : > { %v1642_v43 = vsel %vm714_vm1, %v3568_v39, -inf }
 0x57a   : > { %1643 = vmax.xlane.f32.xlu0 %v1642_v43 }
 0x57c   : > { %1425 = vrot.lane.b32.xlu2 %v2523_v36, %s2814_s29  ;;  %v1551_v49 = vpop.permute.xlu0 %1550 }
 0x57d   : > { %v1616_v4 = vadd.f32 %v1615_v45, %v1551_v49 }
 0x57f   : > { %v3575_v1 = vadd.f32 %v3555_v29, %v1616_v4 }
 0x581   : > { %v1645_v54 = vsel %vm714_vm1, %v3575_v1, -inf }
 0x582   : > { %1646 = vmax.xlane.f32.xlu0 %v1645_v54  ;;  %v1357_v54 = vsub.f32 %v3452_v23, %v3532_v53 }
 0x583   : > { %1727 = vrot.lane.b32.xlu1 %v2523_v36, %s2815_s22 }
 0x586   : > { %v1342_v58 = vpop.xlane.xlu2 %1341 }
 0x587   : > { %v1358_v7 = vsub.f32 %v3525_v40, %v1342_v58  ;;  %v1377_v40 = vmul.f32 1.442695, %v1362_v50 }
 0x589   : > { %v1369_v14 = vmul.f32 1.442695, %v1358_v7 }
 0x58b   : > { %1427 = vrot.lane.b32.xlu1 %v3491_v27, %s2814_s29  ;;  %2460 = vpow2.f32 %v1369_v14 }
 0x58c   : > { %v1559_v20 = vpop.permute.xlu0 %1558  ;;  %2462 = vpow2.f32 %v1377_v40 }
 0x58e   : > { %v1732_v42 = vpop.permute.xlu2 %1731 }
 0x58f   : > { %1753 = vmatpush.bf16.msra.mxu2 %v1732_v42 }
 0x591   : > { %v3598_v3 = vpop.eup %2460 }
 0x592   : > { %v1388_v15 = vsel %vm714_vm1, %v3598_v3, 0.0  ;;  %v3607_v35 = vpop.eup %2462 }
 0x593   : > { %1725 = vrot.lane.b32.xlu1 %v3585_v8, %s2815_s22  ;;  %1754 = vmatpush.bf16.msra.mxu2 %v1730_v0  ;;  %v1621_v0 = vadd.f32 %v1620_v24, %v1559_v20  ;;  %v1400_v37 = vsel %vm714_vm1, %v3607_v35, 0.0 }
 0x594   : > { %v1563_v31 = vpop.permute.xlu0 %1562 }
 0x595   : > { %v3605_v17 = vadd.f32 %v3555_v29, %v1621_v0  ;;  %v1623_v43 = vadd.f32 %v1622_v38, %v1563_v31  ;;  %v1359_v38 = vsub.f32 %v3460_v52, %v3537_v10 }
 0x596   : > { %v1555_v13 = vpop.permute.xlu2 %1554 }
 0x597   : > { %v1618_v6 = vadd.f32 %v1617_v28, %v1555_v13  ;;  %v1651_v11 = vsel %vm714_vm1, %v3605_v17, -inf  ;;  %v3614_v45 = vadd.f32 %v3555_v29, %v1623_v43 }
 0x599   : > { %v3590_v5 = vadd.f32 %v3555_v29, %v1618_v6  ;;  %v1654_v36 = vsel %vm714_vm1, %v3614_v45, -inf  ;;  %v1367_v29 = vmul.f32 1.442695, %v1357_v54 }
 0x59b   : > { %v1648_v27 = vsel %vm714_vm1, %v3590_v5, -inf }
 0x59c   : > { %1649 = vmax.xlane.f32.xlu0 %v1648_v27 }
 0x5a4   : > { %1383 = vadd.xlane.f32.xlu0 %v1382_v62 }
 0x5a5   : > { %1389 = vadd.xlane.f32.xlu2 %v1388_v15 }
 0x5ac   : > { %1652 = vmax.xlane.f32.xlu0 %v1651_v11 }
 0x5ad   : > { %1401 = vadd.xlane.f32.xlu2 %v1400_v37 }
 0x5bd   : > { %1655 = vmax.xlane.f32.xlu1 %v1654_v36  ;;  %v1371_v36 = vmul.f32 1.442695, %v1359_v38 }
 0x5c5   : > { %1790 = vrot.lane.b32.xlu2 %v3503_v2, %s2815_s22 }
 0x5cd   : > { %1796 = vrot.lane.b32.xlu2 %v3509_v57, %s2815_s22 }
 0x5cf   : > { %v1635_v49 = vpop.xlane.xlu2 %1634 }
 0x5d0   : > { %v1657_v4 = vsub.f32 %v3541_v9, %v1635_v49 }
 0x5d2   : > { %v1665_v58 = vmul.f32 1.442695, %v1657_v4 }
 0x5d4   : > { %2464 = vpow2.f32 %v1665_v58 }
 0x5d5   : > { %2466 = vpow2.f32 %v1367_v29 }
 0x5d7   : > { %v1381_v24 = vpop.xlane.xlu2 %1380 }
 0x5da   : > { %v3625_v42 = vpop.eup %2464 }
 0x5db   : > { %v1681_v56 = vsel %vm714_vm1, %v3625_v42, 0.0  ;;  %v3630_v57 = vpop.eup %2466 }
 0x5dc   : > { %1682 = vadd.xlane.f32.xlu0 %v1681_v56  ;;  %v1385_v23 = vsel %vm714_vm1, %v3630_v57, 0.0 }
 0x5dd   : > { %v1638_v2 = vpop.xlane.xlu1 %1637 }
 0x5de   : > { %v1658_v7 = vsub.f32 %v3558_v26, %v1638_v2 }
 0x5df   : > { %v1426_v11 = vpop.permute.xlu2 %1425 }
 0x5e0   : > { %v1667_v28 = vmul.f32 1.442695, %v1658_v7 }
 0x5e2   : > { %2468 = vpow2.f32 %v1667_v28 }
 0x5e4   : > { %1386 = vadd.xlane.f32.xlu0 %v1385_v23 }
 0x5e5   : > { %v1641_v53 = vpop.xlane.xlu0 %1640 }
 0x5e6   : > { %v1659_v54 = vsub.f32 %v3563_v51, %v1641_v53  ;;  %v1361_v51 = vsub.f32 %v3482_v34, %v3549_v16  ;;  %v1360_v53 = vsub.f32 %v3467_v63, %v3543_v12 }
 0x5e8   : > { %v3634_v9 = vpop.eup %2468  ;;  %v1669_v52 = vmul.f32 1.442695, %v1659_v54 }
 0x5e9   : > { %v1684_v21 = vsel %vm714_vm1, %v3634_v9, 0.0 }
 0x5ea   : > { %1685 = vadd.xlane.f32.xlu1 %v1684_v21  ;;  %v1373_v21 = vmul.f32 1.442695, %v1360_v53 }
 0x5ed   : > { %v1644_v13 = vpop.xlane.xlu0 %1643 }
 0x5ee   : > { %v1660_v14 = vsub.f32 %v3568_v39, %v1644_v13 }
 0x5f0   : > { %v1671_v6 = vmul.f32 1.442695, %v1660_v14 }
 0x5f2   : > { %2470 = vpow2.f32 %v1671_v6 }
 0x5f5   : > { %v1647_v26 = vpop.xlane.xlu0 %1646  ;;  %v1728_v50 = vpop.permute.xlu1 %1727 }
 0x5f6   : > { %v1661_v27 = vsub.f32 %v3575_v1, %v1647_v26  ;;  %1755 = vmatpush.bf16.msra.mxu2 %v1728_v50 }
 0x5f8   : > { %v3640_v40 = vpop.eup %2470  ;;  %v1673_v20 = vmul.f32 1.442695, %v1661_v27 }
 0x5f9   : > { %v1690_v0 = vsel %vm714_vm1, %v3640_v40, 0.0 }
 0x5fa   : > { %2472 = vpow2.f32 %v1673_v20  ;;  %1691 = vadd.xlane.f32.xlu0 %v1690_v0 }
 0x5fd   : > { %v1428_v62 = vpop.permute.xlu1 %1427 }
 0x5fe   : > { %1452 = vmatpush.bf16.msra.mxu0 %v1428_v62 }
 0x600   : > { %v3644_v15 = vpop.eup %2472 }
 0x601   : > { %v1693_v39 = vsel %vm714_vm1, %v3644_v15, 0.0 }
 0x602   : > { %1694 = vadd.xlane.f32.xlu0 %v1693_v39  ;;  %1453 = vmatpush.bf16.msra.mxu0 %v1426_v11 }
 0x603   : > { %1423 = vrot.lane.b32.xlu1 %v3585_v8, %s2814_s29 }
 0x605   : > { %v1726_v1 = vpop.permute.xlu1 %1725 }
 0x606   : > { %1756 = vmatpush.bf16.msra.mxu2 %v1726_v1 }
 0x60f   : > { %v1650_v37 = vpop.xlane.xlu0 %1649 }
 0x610   : > { %v1662_v31 = vsub.f32 %v3590_v5, %v1650_v37 }
 0x612   : > { %v1675_v43 = vmul.f32 1.442695, %v1662_v31 }
 0x614   : > { %2474 = vpow2.f32 %v1675_v43 }
 0x615   : > { %2476 = vrcp.f32 %v1381_v24 }
 0x617   : > { %v1384_v49 = vpop.xlane.xlu0 %1383 }
 0x618   : > { %2478 = vrcp.f32 %v1384_v49  ;;  %v1390_v1 = vpop.xlane.xlu2 %1389 }
 0x619   : > { %2480 = vpow2.f32 %v1371_v36 }
 0x61a   : > { %v3653_v4 = vpop.eup %2474  ;;  %2482 = vpow2.f32 %v1669_v52 }
 0x61b   : > { %v1696_v8 = vsel %vm714_vm1, %v3653_v4, 0.0  ;;  %v2477_v58 = vpop.eup %2476 }
 0x61c   : > { %1697 = vadd.xlane.f32.xlu0 %v1696_v8  ;;  %v1411_v29 = vmul.f32 %v2477_v58, %v3547_v22 }
 0x61e   : > { %v2479_v5 = vpop.eup %2478 }
 0x61f   : > { %v1412_v10 = vmul.f32 %v2479_v5, %v3596_v44  ;;  %v1653_v56 = vpop.xlane.xlu0 %1652  ;;  %v3660_v2 = vpop.eup %2480  ;;  %v1375_v44 = vmul.f32 1.442695, %v1361_v51 }
 0x620   : > { %v1663_v7 = vsub.f32 %v3605_v17, %v1653_v56  ;;  %v1391_v22 = vsel %vm714_vm1, %v3660_v2, 0.0  ;;  %v2483_v13 = vpop.eup %2482  ;;  %v1402_v53 = vpop.xlane.xlu2 %1401 }
 0x621   : > { %v1419_v28 = vpack.c.bf16 %v1412_v10, %v1411_v29  ;;  %v1687_v16 = vsel %vm714_vm1, %v2483_v13, 0.0 }
 0x622   : > { %v1677_v23 = vmul.f32 1.442695, %v1663_v7 }
 0x624   : > { %2484 = vpow2.f32 %v1677_v23  ;;  %1392 = vadd.xlane.f32.xlu0 %v1391_v22 }
 0x625   : > { %2486 = vpow2.f32 %v1375_v44 }
 0x626   : > { %2488 = vpow2.f32 %v1373_v21 }
 0x62a   : > { %v3669_v14 = vpop.eup %2484 }
 0x62b   : > { %v1699_v34 = vsel %vm714_vm1, %v3669_v14, 0.0  ;;  %v3674_v63 = vpop.eup %2486 }
 0x62c   : > { %1700 = vadd.xlane.f32.xlu0 %v1699_v34  ;;  %v2489_v17 = vpop.eup %2488  ;;  %v1397_v50 = vsel %vm714_vm1, %v3674_v63, 0.0 }
 0x62d   : > { %1688 = vadd.xlane.f32.xlu1 %v1687_v16  ;;  %v1394_v27 = vsel %vm714_vm1, %v2489_v17, 0.0 }
 0x630   : > { %v1656_v12 = vpop.xlane.xlu1 %1655 }
 0x631   : > { %v1664_v6 = vsub.f32 %v3614_v45, %v1656_v12 }
 0x633   : > { %v1679_v26 = vmul.f32 1.442695, %v1664_v6 }
 0x634   : > { %1398 = vadd.xlane.f32.xlu0 %v1397_v50 }
 0x635   : > { %2490 = vpow2.f32 %v1679_v26  ;;  %1395 = vadd.xlane.f32.xlu1 %v1394_v27 }
 0x63b   : > { %v3680_v20 = vpop.eup %2490 }
 0x63c   : > { %v1702_v24 = vsel %vm714_vm1, %v3680_v20, 0.0 }
 0x63d   : > { %1703 = vadd.xlane.f32.xlu1 %v1702_v24 }
 0x648   : > { %1788 = vrot.lane.b32.xlu0 %v3501_v30, %s2815_s22 }
 0x64f   : > { %v1683_v45 = vpop.xlane.xlu0 %1682 }
 0x650   : > { %1792 = vrot.lane.b32.xlu0 %v3505_v60, %s2815_s22  ;;  %2492 = vrcp.f32 %v1683_v45 }
 0x656   : > { %1786 = vrot.lane.b32.xlu1 %v3499_v32, %s2815_s22  ;;  %v2493_v62 = vpop.eup %2492 }
 0x657   : > { %v1713_v30 = vmul.f32 %v2493_v62, %v3625_v42 }
 0x658   : > { %1798 = vrot.lane.b32.xlu0 %v3511_v18, %s2815_s22  ;;  %v1387_v18 = vpop.xlane.xlu0 %1386 }
 0x65d   : > { %v1686_v0 = vpop.xlane.xlu1 %1685 }
 0x65e   : > { %2494 = vrcp.f32 %v1686_v0  ;;  %1794 = vrot.lane.b32.xlu1 %v3507_v41, %s2815_s22 }
 0x65f   : > { %2496 = vrcp.f32 %v1387_v18 }
 0x660   : > { %2498 = vrcp.f32 %v1390_v1 }
 0x664   : > { %v2495_v39 = vpop.eup %2494 }
 0x665   : > { %v1714_v11 = vmul.f32 %v2495_v39, %v3634_v9  ;;  %v2497_v41 = vpop.eup %2496 }
 0x666   : > { %1800 = vrot.lane.b32.xlu1 %v3513_v59, %s2815_s22  ;;  %v2499_v37 = vpop.eup %2498  ;;  %v1413_v42 = vmul.f32 %v2497_v41, %v3630_v57  ;;  %v1791_v41 = vpop.permute.xlu2 %1790 }
 0x667   : > { %v1721_v32 = vpack.c.bf16 %v1714_v11, %v1713_v30  ;;  %v1414_v9 = vmul.f32 %v2499_v37, %v3598_v3 }
 0x669   : > { %2243 = vmatmul.msk.bf16.vlgmr.msra.gmra.mxu2 %vm714_vm1, %v1721_v32  ;;  %v1420_v38 = vpack.c.bf16 %v1414_v9, %v1413_v42 }
 0x66d   : > { %v1692_v31 = vpop.xlane.xlu0 %1691 }
 0x66e   : > { %2500 = vrcp.f32 %v1692_v31  ;;  %v1797_v37 = vpop.permute.xlu2 %1796 }
 0x674   : > { %v2501_v54 = vpop.eup %2500 }
 0x675   : > { %v1424_v60 = vpop.permute.xlu1 %1423  ;;  %v1695_v59 = vpop.xlane.xlu0 %1694  ;;  %v1716_v52 = vmul.f32 %v2501_v54, %v3640_v40 }
 0x676   : > { %1454 = vmatpush.bf16.msra.mxu0 %v1424_v60 }
 0x679   : > { %2219 = vmatmul.msk.bf16.vlgmr.msra.gmra.mxu0 %vm714_vm1, %v1419_v28 }
 0x689   : > { %2220 = vmatmul.msk.bf16.gmra.mxu0 %vm714_vm1, %v1420_v38 }
 0x68f   : > { %v1698_v43 = vpop.xlane.xlu0 %1697 }
 0x697   : > { %v1393_v36 = vpop.xlane.xlu0 %1392 }
 0x69f   : > { %v1701_v58 = vpop.xlane.xlu0 %1700 }
 0x6a0   : > { %v1689_v49 = vpop.xlane.xlu1 %1688 }
 0x6a1   : > { %2502 = vrcp.f32 %v1689_v49 }
 0x6a2   : > { %2504 = vrcp.f32 %v1393_v36 }
 0x6a7   : > { %v2503_v8 = vpop.eup %2502  ;;  %v1399_v28 = vpop.xlane.xlu0 %1398 }
 0x6a8   : > { %v1396_v5 = vpop.xlane.xlu1 %1395  ;;  %v1715_v29 = vmul.f32 %v2503_v8, %v2483_v13  ;;  %v2505_v3 = vpop.eup %2504 }
 0x6a9   : > { %2506 = vrcp.f32 %v1396_v5  ;;  %v1415_v56 = vmul.f32 %v2505_v3, %v3660_v2 }
 0x6aa   : > { %v1722_v57 = vpack.c.bf16 %v1716_v52, %v1715_v29  ;;  %2508 = vrcp.f32 %v1698_v43 }
 0x6ab   : > { %2510 = vrcp.f32 %v1695_v59 }
 0x6ac   : > { %2244 = vmatmul.msk.bf16.gmra.mxu2 %vm714_vm1, %v1722_v57  ;;  %2512 = vrcp.f32 %v1399_v28 }
 0x6ad   : > { %2514 = vrcp.f32 %v1402_v53 }
 0x6af   : > { %v2507_v10 = vpop.eup %2506 }
 0x6b0   : > { %v1416_v7 = vmul.f32 %v2507_v10, %v2489_v17  ;;  %v2509_v23 = vpop.eup %2508  ;;  %v1704_v21 = vpop.xlane.xlu1 %1703 }
 0x6b1   : > { %v2511_v22 = vpop.eup %2510  ;;  %v1718_v40 = vmul.f32 %v2509_v23, %v3653_v4  ;;  %2516 = vrcp.f32 %v1704_v21 }
 0x6b2   : > { %v1421_v51 = vpack.c.bf16 %v1416_v7, %v1415_v56  ;;  %v1717_v44 = vmul.f32 %v2511_v22, %v3644_v15  ;;  %v2513_v34 = vpop.eup %2512  ;;  %2518 = vrcp.f32 %v1701_v58 }
 0x6b3   : > { %v2515_v2 = vpop.eup %2514  ;;  %v1417_v16 = vmul.f32 %v2513_v34, %v3674_v63 }
 0x6b4   : > { %2221 = vmatmul.msk.bf16.gmra.mxu0 %vm714_vm1, %v1421_v51  ;;  %v1723_v13 = vpack.c.bf16 %v1718_v40, %v1717_v44  ;;  %v1418_v12 = vmul.f32 %v2515_v2, %v3607_v35 }
 0x6b6   : > { %v1422_v17 = vpack.c.bf16 %v1418_v12, %v1417_v16 }
 0x6b7   : > { %v2517_v6 = vpop.eup %2516 }
 0x6b8   : > { %v2519_v4 = vpop.eup %2518  ;;  %v1720_v26 = vmul.f32 %v2517_v6, %v3680_v20 }
 0x6b9   : > { %v1719_v15 = vmul.f32 %v2519_v4, %v3669_v14 }
 0x6ba   : > { %v1789_v31 = vpop.permute.xlu0 %1788 }
 0x6bb   : > { %v1724_v50 = vpack.c.bf16 %v1720_v26, %v1719_v15  ;;  %v1875_v58 = vsel %vm556_vm0, %v3420_v46, %v1789_v31 }
 0x6bc   : > { %2245 = vmatmul.msk.bf16.gmra.mxu2 %vm714_vm1, %v1723_v13 }
 0x6c2   : > { %v1793_v38 = vpop.permute.xlu0 %1792 }
 0x6c4   : > { %2222 = vmatmul.msk.bf16.gmra.mxu0 %vm714_vm1, %v1422_v17 }
 0x6c8   : > { %v1787_v42 = vpop.permute.xlu1 %1786 }
 0x6c9   : > { %v1874_v51 = vsel %vm556_vm0, %v3416_v33, %v1787_v42 }
 0x6ca   : > { %v1799_v36 = vpop.permute.xlu0 %1798 }
 0x6cc   : > { %2246 = vmatmul.msk.bf16.gmra.mxu2 %vm714_vm1, %v1724_v50 }
 0x6d0   : > { %v1795_v59 = vpop.permute.xlu1 %1794 }
 0x6d1   : > { %v1878_v10 = vsel %vm556_vm0, %v3430_v48, %v1795_v59  ;;  %v1877_v48 = vsel %vm556_vm0, %v3427_v25, %v1793_v38  ;;  %v1880_v25 = vsel %vm556_vm0, %v3436_v47, %v1799_v36 }
 0x6d8   : > { %v1801_v49 = vpop.permute.xlu1 %1800 }
 0x6d9   : > { %v1881_v21 = vsel %vm556_vm0, %v3438_v61, %v1801_v49  ;;  %v1876_v61 = vsel %vm556_vm0, %v3423_v19, %v1791_v41  ;;  %v1879_v19 = vsel %vm556_vm0, %v3434_v55, %v1797_v37 }
 0x6ec   : > { %v1758_v45 = vpop.f32.mrf.mxu2 }
 0x6f4   : > { %v1760_v0 = vpop.f32.mrf.mxu2 }
 0x6f6   : > { %v1456_v27 = vpop.f32.mrf.mxu0 }
 0x6f7   : > { %1818 = vrot.lane.b32.xlu2 %v1456_v27, %s2814_s29 }
 0x6fe   : > { %v1458_v24 = vpop.f32.mrf.mxu0 }
 0x6ff   : > { %1820 = vrot.lane.b32.xlu0 %v1458_v24, %s2814_s29 }
 0x706   : > { %v1461_v63 = vpop.f32.mrf.mxu0 }
 0x707   : > { %1822 = vrot.lane.b32.xlu1 %v1461_v63, %s2814_s29 }
 0x70e   : > { %v1463_v35 = vpop.f32.mrf.mxu0 }
 0x70f   : > { %1824 = vrot.lane.b32.xlu2 %v1463_v35, %s2814_s29 }
 0x72f   : > { %v1763_v20 = vpop.f32.mrf.mxu2 }
 0x731   : > { %v1466_v62 = vpop.f32.mrf.mxu0 }
 0x732   : > { %1826 = vrot.lane.b32.xlu0 %v1466_v62, %s2814_s29 }
 0x737   : > { %v1765_v14 = vpop.f32.mrf.mxu2 }
 0x739   : > { %v1468_v39 = vpop.f32.mrf.mxu0 }
 0x73a   : > { %1828 = vrot.lane.b32.xlu1 %v1468_v39, %s2814_s29 }
 0x73f   : > { %v1768_v30 = vpop.f32.mrf.mxu2 }
 0x741   : > { %v1471_v11 = vpop.f32.mrf.mxu0 }
 0x742   : > { %1850 = vrot.lane.b32.xlu1 %v1758_v45, %s2805_s30  ;;  %1830 = vrot.lane.b32.xlu2 %v1471_v11, %s2814_s29 }
 0x747   : > { %v1770_v32 = vpop.f32.mrf.mxu2 }
 0x749   : > { %v1473_v60 = vpop.f32.mrf.mxu0 }
 0x74a   : > { %1856 = vrot.lane.b32.xlu1 %v1765_v14, %s2805_s30  ;;  %1852 = vrot.lane.b32.xlu2 %v1760_v0, %s2805_s30 }
 0x74b   : > { %1832 = vrot.lane.b32.xlu0 %v1473_v60, %s2814_s29 }
 0x74f   : > { %v1773_v18 = vpop.f32.mrf.mxu2 }
 0x751   : > { %v1819_v9 = vpop.permute.xlu2 %1818 }
 0x752   : > { %1862 = vrot.lane.b32.xlu1 %v1773_v18, %s2805_s30  ;;  %1858 = vrot.lane.b32.xlu2 %v1768_v30, %s2805_s30  ;;  %v1882_v23 = vsel %vm714_vm1, %v1874_v51, %v1819_v9 }
 0x753   : > { %1854 = vrot.lane.b32.xlu0 %v1763_v20, %s2805_s30 }
 0x757   : > { %v1775_v1 = vpop.f32.mrf.mxu2 }
 0x75a   : > { %1864 = vrot.lane.b32.xlu2 %v1775_v1, %s2805_s30 }
 0x75b   : > { %1860 = vrot.lane.b32.xlu0 %v1770_v32, %s2805_s30 }
 0x769   : > { %v1825_v43 = vpop.permute.xlu2 %1824 }
 0x76a   : > { %v1885_v40 = vsel %vm714_vm1, %v1877_v48, %v1825_v43 }
 0x771   : > { %v1821_v8 = vpop.permute.xlu0 %1820 }
 0x772   : > { %v1883_v5 = vsel %vm714_vm1, %v1875_v58, %v1821_v8 }
 0x779   : > { %v1823_v29 = vpop.permute.xlu1 %1822 }
 0x77a   : > { %v1884_v6 = vsel %vm714_vm1, %v1876_v61, %v1823_v29 }
 0x79c   : > { %v1831_v54 = vpop.permute.xlu2 %1830 }
 0x79d   : > { %v1888_v12 = vsel %vm714_vm1, %v1880_v25, %v1831_v54 }
 0x7a4   : > { %v1853_v52 = vpop.permute.xlu2 %1852  ;;  %v1827_v3 = vpop.permute.xlu0 %1826 }
 0x7a5   : > { %v1892_v57 = vsel %vm1890_vm2, %v1883_v5, %v1853_v52  ;;  %v1886_v56 = vsel %vm714_vm1, %v1878_v10, %v1827_v3 }
 0x7a6   : > { %1900 = vst [vmem:[%s3738_s11 + $0x8] sm:$0xff] %v1892_v57 }
 0x7ac   : > { %v1829_v46 = vpop.permute.xlu1 %1828  ;;  %v1859_v7 = vpop.permute.xlu2 %1858 }
 0x7ad   : > { %v1895_v28 = vsel %vm1890_vm2, %v1886_v56, %v1859_v7  ;;  %v1887_v47 = vsel %vm714_vm1, %v1879_v19, %v1829_v46 }
 0x7ae   : > { %1903 = vst [vmem:[%s3738_s11 + $0x20] sm:$0xff] %v1895_v28 }
 0x7b4   : > { %v1851_v53 = vpop.permute.xlu1 %1850  ;;  %v1865_v34 = vpop.permute.xlu2 %1864 }
 0x7b5   : > { %v1891_v22 = vsel %vm1890_vm2, %v1882_v23, %v1851_v53 }
 0x7b6   : > { %1899 = vst [vmem:[%s3738_s11] sm:$0xff] %v1891_v22 }
 0x7bc   : > { %v1857_v44 = vpop.permute.xlu1 %1856 }
 0x7bd   : > { %v1894_v13 = vsel %vm1890_vm2, %v1885_v40, %v1857_v44  ;;  %v1833_v33 = vpop.permute.xlu0 %1832 }
 0x7be   : > { %1902 = vst [vmem:[%s3738_s11 + $0x18] sm:$0xff] %v1894_v13  ;;  %v1889_v2 = vsel %vm714_vm1, %v1881_v21, %v1833_v33 }
 0x7bf   : > { %v1898_v16 = vsel %vm1890_vm2, %v1889_v2, %v1865_v34 }
 0x7c0   : > { %1906 = vst [vmem:[%s3738_s11 + $0x38] sm:$0xff] %v1898_v16 }
 0x7c4   : > { %v1863_v17 = vpop.permute.xlu1 %1862 }
 0x7c5   : > { %v1897_v4 = vsel %vm1890_vm2, %v1888_v12, %v1863_v17  ;;  %v1855_v26 = vpop.permute.xlu0 %1854 }
 0x7c6   : > { %1905 = vst [vmem:[%s3738_s11 + $0x30] sm:$0xff] %v1897_v4  ;;  %v1893_v15 = vsel %vm1890_vm2, %v1884_v6, %v1855_v26 }
 0x7c7   : > { %1901 = vst [vmem:[%s3738_s11 + $0x10] sm:$0xff] %v1893_v15 }
 0x7cd   : > { %v1861_v50 = vpop.permute.xlu0 %1860 }
 0x7ce   : > { %v1896_v27 = vsel %vm1890_vm2, %v1887_v47, %v1861_v50 }
 0x7cf   : > { %1904 = vst [vmem:[%s3738_s11 + $0x28] sm:$0xff] %v1896_v27 }
 0x7d0   : > { %2732 = shalt.err (!%p2729_p12)
}
 0x7d1   : > { %s2816_s20 = smov 128   ;;  %s2817_s24 = smov 8  }
 0x7d2   : > { %2290 = dma.vmem_to_hbm [thread:$0]  (%p2938_p5), %s1923_s17, 1024, %s1925_s18, %s1908_s19, %s2816_s20, %s2816_s20, %s2817_s24  }
 0x7d3 PF: > { %s3857_s29 = sld [smem:[#allocation19_spill]] }
 0x7d4   : > { %s3859_s0 = sld [smem:[#allocation21_spill]] }
 0x7d9   : > { %s1939_s14 = sand.u32 1, %s3857_s29  }
 0x7da   : > { %p3860_p13 = scmp.ge.s32.totalorder %s3859_s0, 2  ;;  %s1940_s8 = scalar_lea.sflag [#allocation4], %s1939_s14 }
 0x7dc   : > { %p2313_p0 = pnand %p3860_p13, %p2903_p6 }
 0x7de   : > { %p2314_p3 = pneg %p2313_p0 }
 0x7e0   : > { %2774 = dma.done.wait (%p2314_p3), %s1940_s8, 1024  }
 0x7e1   : > { %2776 = vsyncadd (%p2314_p3), %s1940_s8, 4294966272  ;;  %s30_s29 = sadd.s32 1, %s3859_s0   ;;  %s3861_s21 = sld [smem:[#allocation20_spill]] }
 0x7e2   : > { %p27_p7 = scmp.ge.s32.totalorder %s30_s29, 4   ;;  %s3862_s26 = sld [smem:[#allocation25_spill]] }
 0x7e3   : > { %s3863_s11 = sld [smem:[#allocation23_spill]]  ;;  %s3864_s24 = smov %s2783_s25 }
 0x7e4   : > { %s3866_s27 = smov %s2795_s28 }
 0x7e5   :  { %29 = sbr.rel (!%p27_p7) target bundleno = 15 (0xf), region = 141 }
 0x7e7   : > { %s3865_s25 = smov %s3861_s21 }
 0x7e9   : > { %s3867_s28 = smov %s3863_s11 }
 0x7ea   :  { %1946 = vsyncpa [#allocation3], 1 }
 0x7eb   :  { %1948 = vsyncpa [#allocation3 + $0x1], 1 }
 0x7ec   :  { %1949 = vsyncpa [#allocation6], 1 }
 0x7ed   :  { %1951 = vsyncpa [#allocation6 + $0x1], 1 }
 0x7ee   :  { %1952 = vsyncpa [#allocation9], 1 }
 0x7ef   :  { %1953 = vsyncpa [#allocation12], 1 }
 0x7f0   :  { %1955 = vsyncpa [#allocation12 + $0x1], 1 }
 0x7f1   :  { %1956 = vsyncpa [#allocation4], 1 }
 0x7f2   :  { %1958 = vsyncpa [#allocation4 + $0x1], 1 }

</bundles_post_ra>
